<compile_context>
chip_gen: v7x
topology: tpu7x:2x2x1
jax: 0.10.0
libtpu: 0.0.40
codegen_flags: <defaults>
</compile_context>

<pallas_src>
import functools

import jax
import jax.numpy as jnp
from jax.experimental import pallas as pl
from jax.experimental.pallas import tpu as pltpu

ALL_FROM = "all"   # sentinel used by PipelineModule's `from` wiring


# ---------------- fused Pallas kernel ----------------

def _fused_kernel(Cmid, Co, NL, Wp, M,
                  x_ref, w1_ref, b1_ref, w2_ref, b2_ref, mask_ref,
                  o_ref, y1_ref):
    """conv3x3(pad=1) + bias -> ReLU -> conv3x3(pad=1) + bias -> + residual.

    Frame layout: activations live on a zero-bordered (H+2, W+2) lattice,
    flattened per image to length L = (H+2)*(W+2) and concatenated over the
    batch (lane axis length NL = N*L), with an extra M-lane zero margin on
    each side.  A conv tap (dh, dw) is then just the static lane-offset slice
    starting at M + dh*Wp + dw.  Interior frame positions never read the
    margins or a neighbouring image's block, so the taps need no masking; the
    frame border (which doubles as the conv's zero padding) is re-zeroed with
    `mask` before feeding the second conv.
    """
    mask = mask_ref[...]                                   # (1, NL)
    shifts = [dh * Wp + dw for dh in (-1, 0, 1) for dw in (-1, 0, 1)]

    # ---- conv1: 9 shifted taps on the MXU, f32 accumulation ----
    acc1 = jnp.zeros((Cmid, NL), jnp.float32)
    for t, s in enumerate(shifts):
        tap = x_ref[:, M + s:M + s + NL]                   # (Ci, NL)
        acc1 = acc1 + jnp.dot(w1_ref[t], tap,
                              preferred_element_type=jnp.float32)

    # bias + ReLU epilogue (f32, VPU), re-zero the frame border so it acts as
    # conv2's zero padding, then stash the frame in VMEM scratch (zero margins).
    y1 = jnp.maximum(acc1 + b1_ref[...], 0.0) * mask       # (Cmid, NL)
    y1_ref[...] = jnp.zeros_like(y1_ref)
    y1_ref[:, M:M + NL] = y1

    # ---- conv2: 9 shifted taps + bias + residual add ----
    acc2 = jnp.zeros((Co, NL), jnp.float32)
    for t, s in enumerate(shifts):
        tap = y1_ref[:, M + s:M + s + NL]                  # (Cmid, NL)
        acc2 = acc2 + jnp.dot(w2_ref[t], tap,
                              preferred_element_type=jnp.float32)

    resid = x_ref[:, M:M + NL]      # (Ci == Co, NL): border is 0, interior = x
    o_ref[...] = (acc2 + b2_ref[...] + resid).astype(o_ref.dtype)


# ---------------- Pallas-backed fused op (wrapper) ----------------

def conv_relu_conv_residual(x, w1, b1, w2, b2):
    """Conv2d(Ci->Cmid,3x3,pad=1) -> ReLU -> Conv2d(Cmid->Co,3x3,pad=1) -> +x.

    NCHW, PyTorch Conv2d semantics.  One grid-less pallas_call; all layout
    work outside the kernel is cheap XLA glue fused into the surrounding jit.
    """
    N, Ci, H, W = x.shape
    Cmid = w1.shape[0]
    Co = w2.shape[0]
    assert Co == Ci, "residual add requires matching channel counts"
    Hp, Wp = H + 2, W + 2
    L = Hp * Wp
    NL = N * L
    M = 128                        # lane margin (>= Wp + 1), vreg-aligned
    EXT = NL + 2 * M

    # frame layout (C, N*L): the zero border doubles as the conv zero padding
    xf = jnp.pad(x, ((0, 0), (0, 0), (1, 1), (1, 1)))          # (N, Ci, Hp, Wp)
    xf = jnp.transpose(xf, (1, 0, 2, 3)).reshape(Ci, NL)       # (Ci, N*L)
    xf = jnp.pad(xf, ((0, 0), (M, M)))                         # (Ci, EXT)

    # per-tap weight slabs, tap index t = kh*3 + kw
    w1t = jnp.transpose(w1, (2, 3, 0, 1)).reshape(9, Cmid, Ci)
    w2t = jnp.transpose(w2, (2, 3, 0, 1)).reshape(9, Co, Cmid)

    # interior-frame mask (1.0 on real pixels, 0.0 on the zero border)
    fi = jnp.arange(L) // Wp
    fj = jnp.arange(L) % Wp
    interior = ((fi >= 1) & (fi <= H) & (fj >= 1) & (fj <= W))
    mask = jnp.tile(interior.astype(x.dtype), N).reshape(1, NL)

    kernel = functools.partial(_fused_kernel, Cmid, Co, NL, Wp, M)
    flops = 2 * 9 * NL * (Ci * Cmid + Cmid * Co) + 5 * NL * (Cmid + Co)
    bytes_accessed = 4 * (Ci * EXT + 9 * (Cmid * Ci + Co * Cmid)
                          + Cmid + Co + NL + Co * NL)

    out_f = pl.pallas_call(
        kernel,
        out_shape=jax.ShapeDtypeStruct((Co, NL), x.dtype),
        scratch_shapes=[pltpu.VMEM((Cmid, EXT), jnp.float32)],
        cost_estimate=pl.CostEstimate(flops=flops, transcendentals=0,
                                      bytes_accessed=bytes_accessed),
    )(xf, w1t, b1.reshape(Cmid, 1), w2t, b2.reshape(Co, 1), mask)

    out = out_f.reshape(Co, N, Hp, Wp)[:, :, 1:H + 1, 1:W + 1]  # drop border
    return jnp.transpose(out, (1, 0, 2, 3))                     # back to NCHW


# ---------------- PipelineModule forward semantics ----------------

class PallasPipelineModule:
    """Mirrors kurisunet PipelineModule.forward: results-dict + `from` wiring.

    modules: tuple of (result_index, (from_tuple, callable)), where from_tuple
    is a tuple of (source_index, selector) and selector == ALL_FROM means the
    whole result, otherwise results[source_index][selector].
    """
    # TODO(synk): registration/drop/resort/add_drop are host-side nn.Module
    # bookkeeping (no compute) and have no Pallas equivalent; only forward()
    # semantics are reproduced here.

    def __init__(self, name, modules):
        self._name = name
        self._modules = tuple(modules)

    def __call__(self, *x):
        results = {0: x[0] if len(x) == 1 else x}
        for i, (f, m) in self._modules:
            x = m(*(results[k] if v == ALL_FROM else results[k][v]
                    for k, v in f))
            results[i] = x
        return x


if __name__ == "__main__":
    key = jax.random.PRNGKey(0)
    kx, k1, k2, k3, k4 = jax.random.split(key, 5)

    N, C, H, W, Cmid = 2, 4, 16, 16, 8
    x = jax.random.normal(kx, (N, C, H, W), jnp.float32)

    # Deterministic synthetic parameters (shapes per the instantiated layers).
    w1 = jax.random.normal(k1, (Cmid, C, 3, 3), jnp.float32) * 0.1
    b1 = jax.random.normal(k2, (Cmid,), jnp.float32) * 0.1
    w2 = jax.random.normal(k3, (C, Cmid, 3, 3), jnp.float32) * 0.1
    b2 = jax.random.normal(k4, (C,), jnp.float32) * 0.1

    # The four logical stages (conv1 -> ReLU -> conv2 -> residual add with
    # results[0]) are fused into ONE Pallas kernel; the generic results-dict /
    # `from` wiring of PipelineModule.forward is preserved unchanged.
    pipeline = PallasPipelineModule(
        "PipelineModule",
        modules=(
            (1, (((0, ALL_FROM),),
                 lambda a: conv_relu_conv_residual(a, w1, b1, w2, b2))),
        ),
    )

    out = jax.block_until_ready(jax.jit(lambda a: pipeline(a))(x))

    # Pure-JAX reference for correctness of the whole pipeline.
    def ref_conv(a, w, b):
        y = jax.lax.conv_general_dilated(
            a, w, window_strides=(1, 1), padding=((1, 1), (1, 1)),
            dimension_numbers=("NCHW", "OIHW", "NCHW"))
        return y + b.reshape(1, -1, 1, 1)

    ref = ref_conv(jnp.maximum(ref_conv(x, w1, b1), 0.0), w2, b2) + x
    assert out.shape == (N, C, H, W)
    assert out.dtype == jnp.float32
    assert jnp.allclose(out, ref, atol=1e-4, rtol=1e-4)
    print("KERNEL_OK")
</pallas_src>

<mosaic_0001>
module attributes {stable_mosaic.version = 11 : i64} {
  func.func @_fused_kernel(%arg0: memref<4x904xf32, #tpu.memory_space<vmem>>, %arg1: memref<9x8x4xf32, #tpu.memory_space<vmem>>, %arg2: memref<8x1xf32, #tpu.memory_space<vmem>>, %arg3: memref<9x4x8xf32, #tpu.memory_space<vmem>>, %arg4: memref<4x1xf32, #tpu.memory_space<vmem>>, %arg5: memref<1x648xf32, #tpu.memory_space<vmem>>, %arg6: memref<4x648xf32, #tpu.memory_space<vmem>>, %arg7: memref<8x904xf32, #tpu.memory_space<vmem>>) attributes {dimension_semantics = [], scalar_prefetch = 0 : i64, scratch_operands = 1 : i64, tpu.core_type = #tpu.core_type<tc>} {
    %c0 = arith.constant 0 : index
    %c0_0 = arith.constant 0 : index
    %0 = vector.load %arg5[%c0, %c0_0] : memref<1x648xf32, #tpu.memory_space<vmem>>, vector<1x648xf32>
    %cst = arith.constant 0.000000e+00 : f32
    %1 = vector.broadcast %cst : f32 to vector<8x648xf32>
    %c0_1 = arith.constant 0 : index
    %c109 = arith.constant 109 : index
    %2 = vector.load %arg0[%c0_1, %c109] : memref<4x904xf32, #tpu.memory_space<vmem>>, vector<4x648xf32>
    %c0_2 = arith.constant 0 : index
    %c0_3 = arith.constant 0 : index
    %c0_4 = arith.constant 0 : index
    %3 = vector.load %arg1[%c0_2, %c0_3, %c0_4] : memref<9x8x4xf32, #tpu.memory_space<vmem>>, vector<1x8x4xf32>
    %4 = vector.shape_cast %3 : vector<1x8x4xf32> to vector<8x4xf32>
    %cst_5 = arith.constant dense<0.000000e+00> : vector<8x648xf32>
    %5 = tpu.matmul %4, %2, %cst_5 {dimension_numbers = #tpu.dot_dimension_numbers<[1], [0], [0], [1], [0, 0, 1, 1], [], []>} : vector<8x4xf32>, vector<4x648xf32>, vector<8x648xf32> -> vector<8x648xf32>
    %6 = arith.addf %1, %5 : vector<8x648xf32>
    %c0_6 = arith.constant 0 : index
    %c110 = arith.constant 110 : index
    %7 = vector.load %arg0[%c0_6, %c110] : memref<4x904xf32, #tpu.memory_space<vmem>>, vector<4x648xf32>
    %c1 = arith.constant 1 : index
    %c0_7 = arith.constant 0 : index
    %c0_8 = arith.constant 0 : index
    %8 = vector.load %arg1[%c1, %c0_7, %c0_8] : memref<9x8x4xf32, #tpu.memory_space<vmem>>, vector<1x8x4xf32>
    %9 = vector.shape_cast %8 : vector<1x8x4xf32> to vector<8x4xf32>
    %cst_9 = arith.constant dense<0.000000e+00> : vector<8x648xf32>
    %10 = tpu.matmul %9, %7, %cst_9 {dimension_numbers = #tpu.dot_dimension_numbers<[1], [0], [0], [1], [0, 0, 1, 1], [], []>} : vector<8x4xf32>, vector<4x648xf32>, vector<8x648xf32> -> vector<8x648xf32>
    %11 = arith.addf %6, %10 : vector<8x648xf32>
    %c0_10 = arith.constant 0 : index
    %c111 = arith.constant 111 : index
    %12 = vector.load %arg0[%c0_10, %c111] : memref<4x904xf32, #tpu.memory_space<vmem>>, vector<4x648xf32>
    %c2 = arith.constant 2 : index
    %c0_11 = arith.constant 0 : index
    %c0_12 = arith.constant 0 : index
    %13 = vector.load %arg1[%c2, %c0_11, %c0_12] : memref<9x8x4xf32, #tpu.memory_space<vmem>>, vector<1x8x4xf32>
    %14 = vector.shape_cast %13 : vector<1x8x4xf32> to vector<8x4xf32>
    %cst_13 = arith.constant dense<0.000000e+00> : vector<8x648xf32>
    %15 = tpu.matmul %14, %12, %cst_13 {dimension_numbers = #tpu.dot_dimension_numbers<[1], [0], [0], [1], [0, 0, 1, 1], [], []>} : vector<8x4xf32>, vector<4x648xf32>, vector<8x648xf32> -> vector<8x648xf32>
    %16 = arith.addf %11, %15 : vector<8x648xf32>
    %c0_14 = arith.constant 0 : index
    %c127 = arith.constant 127 : index
    %17 = vector.load %arg0[%c0_14, %c127] : memref<4x904xf32, #tpu.memory_space<vmem>>, vector<4x648xf32>
    %c3 = arith.constant 3 : index
    %c0_15 = arith.constant 0 : index
    %c0_16 = arith.constant 0 : index
    %18 = vector.load %arg1[%c3, %c0_15, %c0_16] : memref<9x8x4xf32, #tpu.memory_space<vmem>>, vector<1x8x4xf32>
    %19 = vector.shape_cast %18 : vector<1x8x4xf32> to vector<8x4xf32>
    %cst_17 = arith.constant dense<0.000000e+00> : vector<8x648xf32>
    %20 = tpu.matmul %19, %17, %cst_17 {dimension_numbers = #tpu.dot_dimension_numbers<[1], [0], [0], [1], [0, 0, 1, 1], [], []>} : vector<8x4xf32>, vector<4x648xf32>, vector<8x648xf32> -> vector<8x648xf32>
    %21 = arith.addf %16, %20 : vector<8x648xf32>
    %c0_18 = arith.constant 0 : index
    %c128 = arith.constant 128 : index
    %22 = vector.load %arg0[%c0_18, %c128] : memref<4x904xf32, #tpu.memory_space<vmem>>, vector<4x648xf32>
    %c4 = arith.constant 4 : index
    %c0_19 = arith.constant 0 : index
    %c0_20 = arith.constant 0 : index
    %23 = vector.load %arg1[%c4, %c0_19, %c0_20] : memref<9x8x4xf32, #tpu.memory_space<vmem>>, vector<1x8x4xf32>
    %24 = vector.shape_cast %23 : vector<1x8x4xf32> to vector<8x4xf32>
    %cst_21 = arith.constant dense<0.000000e+00> : vector<8x648xf32>
    %25 = tpu.matmul %24, %22, %cst_21 {dimension_numbers = #tpu.dot_dimension_numbers<[1], [0], [0], [1], [0, 0, 1, 1], [], []>} : vector<8x4xf32>, vector<4x648xf32>, vector<8x648xf32> -> vector<8x648xf32>
    %26 = arith.addf %21, %25 : vector<8x648xf32>
    %c0_22 = arith.constant 0 : index
    %c129 = arith.constant 129 : index
    %27 = vector.load %arg0[%c0_22, %c129] : memref<4x904xf32, #tpu.memory_space<vmem>>, vector<4x648xf32>
    %c5 = arith.constant 5 : index
    %c0_23 = arith.constant 0 : index
    %c0_24 = arith.constant 0 : index
    %28 = vector.load %arg1[%c5, %c0_23, %c0_24] : memref<9x8x4xf32, #tpu.memory_space<vmem>>, vector<1x8x4xf32>
    %29 = vector.shape_cast %28 : vector<1x8x4xf32> to vector<8x4xf32>
    %cst_25 = arith.constant dense<0.000000e+00> : vector<8x648xf32>
    %30 = tpu.matmul %29, %27, %cst_25 {dimension_numbers = #tpu.dot_dimension_numbers<[1], [0], [0], [1], [0, 0, 1, 1], [], []>} : vector<8x4xf32>, vector<4x648xf32>, vector<8x648xf32> -> vector<8x648xf32>
    %31 = arith.addf %26, %30 : vector<8x648xf32>
    %c0_26 = arith.constant 0 : index
    %c145 = arith.constant 145 : index
    %32 = vector.load %arg0[%c0_26, %c145] : memref<4x904xf32, #tpu.memory_space<vmem>>, vector<4x648xf32>
    %c6 = arith.constant 6 : index
    %c0_27 = arith.constant 0 : index
    %c0_28 = arith.constant 0 : index
    %33 = vector.load %arg1[%c6, %c0_27, %c0_28] : memref<9x8x4xf32, #tpu.memory_space<vmem>>, vector<1x8x4xf32>
    %34 = vector.shape_cast %33 : vector<1x8x4xf32> to vector<8x4xf32>
    %cst_29 = arith.constant dense<0.000000e+00> : vector<8x648xf32>
    %35 = tpu.matmul %34, %32, %cst_29 {dimension_numbers = #tpu.dot_dimension_numbers<[1], [0], [0], [1], [0, 0, 1, 1], [], []>} : vector<8x4xf32>, vector<4x648xf32>, vector<8x648xf32> -> vector<8x648xf32>
    %36 = arith.addf %31, %35 : vector<8x648xf32>
    %c0_30 = arith.constant 0 : index
    %c146 = arith.constant 146 : index
    %37 = vector.load %arg0[%c0_30, %c146] : memref<4x904xf32, #tpu.memory_space<vmem>>, vector<4x648xf32>
    %c7 = arith.constant 7 : index
    %c0_31 = arith.constant 0 : index
    %c0_32 = arith.constant 0 : index
    %38 = vector.load %arg1[%c7, %c0_31, %c0_32] : memref<9x8x4xf32, #tpu.memory_space<vmem>>, vector<1x8x4xf32>
    %39 = vector.shape_cast %38 : vector<1x8x4xf32> to vector<8x4xf32>
    %cst_33 = arith.constant dense<0.000000e+00> : vector<8x648xf32>
    %40 = tpu.matmul %39, %37, %cst_33 {dimension_numbers = #tpu.dot_dimension_numbers<[1], [0], [0], [1], [0, 0, 1, 1], [], []>} : vector<8x4xf32>, vector<4x648xf32>, vector<8x648xf32> -> vector<8x648xf32>
    %41 = arith.addf %36, %40 : vector<8x648xf32>
    %c0_34 = arith.constant 0 : index
    %c147 = arith.constant 147 : index
    %42 = vector.load %arg0[%c0_34, %c147] : memref<4x904xf32, #tpu.memory_space<vmem>>, vector<4x648xf32>
    %c8 = arith.constant 8 : index
    %c0_35 = arith.constant 0 : index
    %c0_36 = arith.constant 0 : index
    %43 = vector.load %arg1[%c8, %c0_35, %c0_36] : memref<9x8x4xf32, #tpu.memory_space<vmem>>, vector<1x8x4xf32>
    %44 = vector.shape_cast %43 : vector<1x8x4xf32> to vector<8x4xf32>
    %cst_37 = arith.constant dense<0.000000e+00> : vector<8x648xf32>
    %45 = tpu.matmul %44, %42, %cst_37 {dimension_numbers = #tpu.dot_dimension_numbers<[1], [0], [0], [1], [0, 0, 1, 1], [], []>} : vector<8x4xf32>, vector<4x648xf32>, vector<8x648xf32> -> vector<8x648xf32>
    %46 = arith.addf %41, %45 : vector<8x648xf32>
    %c0_38 = arith.constant 0 : index
    %c0_39 = arith.constant 0 : index
    %47 = vector.load %arg2[%c0_38, %c0_39] : memref<8x1xf32, #tpu.memory_space<vmem>>, vector<8x1xf32>
    %48 = vector.broadcast %47 : vector<8x1xf32> to vector<8x648xf32>
    %49 = arith.addf %46, %48 : vector<8x648xf32>
    %cst_40 = arith.constant 0.000000e+00 : f32
    %50 = vector.broadcast %cst_40 : f32 to vector<8x648xf32>
    %51 = arith.maximumf %49, %50 : vector<8x648xf32>
    %52 = vector.broadcast %0 : vector<1x648xf32> to vector<8x648xf32>
    %53 = arith.mulf %51, %52 : vector<8x648xf32>
    %cst_41 = arith.constant 0.000000e+00 : f32
    %54 = vector.broadcast %cst_41 : f32 to vector<8x904xf32>
    %c0_42 = arith.constant 0 : index
    %c0_43 = arith.constant 0 : index
    %55 = vector.load %arg7[%c0_42, %c0_43] : memref<8x904xf32, #tpu.memory_space<vmem>>, vector<8x904xf32>
    tpu.vector_store %arg7[%c0_42, %c0_43], %54 {strides = array<i32>} : memref<8x904xf32, #tpu.memory_space<vmem>>, vector<8x904xf32>,
    %c0_44 = arith.constant 0 : index
    %c128_45 = arith.constant 128 : index
    %56 = vector.load %arg7[%c0_44, %c128_45] : memref<8x904xf32, #tpu.memory_space<vmem>>, vector<8x648xf32>
    tpu.vector_store %arg7[%c0_44, %c128_45], %53 {strides = array<i32>} : memref<8x904xf32, #tpu.memory_space<vmem>>, vector<8x648xf32>,
    %cst_46 = arith.constant 0.000000e+00 : f32
    %57 = vector.broadcast %cst_46 : f32 to vector<4x648xf32>
    %c0_47 = arith.constant 0 : index
    %c109_48 = arith.constant 109 : index
    %58 = vector.load %arg7[%c0_47, %c109_48] : memref<8x904xf32, #tpu.memory_space<vmem>>, vector<8x648xf32>
    %c0_49 = arith.constant 0 : index
    %c0_50 = arith.constant 0 : index
    %c0_51 = arith.constant 0 : index
    %59 = vector.load %arg3[%c0_49, %c0_50, %c0_51] : memref<9x4x8xf32, #tpu.memory_space<vmem>>, vector<1x4x8xf32>
    %60 = vector.shape_cast %59 : vector<1x4x8xf32> to vector<4x8xf32>
    %cst_52 = arith.constant dense<0.000000e+00> : vector<4x648xf32>
    %61 = tpu.matmul %60, %58, %cst_52 {dimension_numbers = #tpu.dot_dimension_numbers<[1], [0], [0], [1], [0, 0, 1, 1], [], []>} : vector<4x8xf32>, vector<8x648xf32>, vector<4x648xf32> -> vector<4x648xf32>
    %62 = arith.addf %57, %61 : vector<4x648xf32>
    %c0_53 = arith.constant 0 : index
    %c110_54 = arith.constant 110 : index
    %63 = vector.load %arg7[%c0_53, %c110_54] : memref<8x904xf32, #tpu.memory_space<vmem>>, vector<8x648xf32>
    %c1_55 = arith.constant 1 : index
    %c0_56 = arith.constant 0 : index
    %c0_57 = arith.constant 0 : index
    %64 = vector.load %arg3[%c1_55, %c0_56, %c0_57] : memref<9x4x8xf32, #tpu.memory_space<vmem>>, vector<1x4x8xf32>
    %65 = vector.shape_cast %64 : vector<1x4x8xf32> to vector<4x8xf32>
    %cst_58 = arith.constant dense<0.000000e+00> : vector<4x648xf32>
    %66 = tpu.matmul %65, %63, %cst_58 {dimension_numbers = #tpu.dot_dimension_numbers<[1], [0], [0], [1], [0, 0, 1, 1], [], []>} : vector<4x8xf32>, vector<8x648xf32>, vector<4x648xf32> -> vector<4x648xf32>
    %67 = arith.addf %62, %66 : vector<4x648xf32>
    %c0_59 = arith.constant 0 : index
    %c111_60 = arith.constant 111 : index
    %68 = vector.load %arg7[%c0_59, %c111_60] : memref<8x904xf32, #tpu.memory_space<vmem>>, vector<8x648xf32>
    %c2_61 = arith.constant 2 : index
    %c0_62 = arith.constant 0 : index
    %c0_63 = arith.constant 0 : index
    %69 = vector.load %arg3[%c2_61, %c0_62, %c0_63] : memref<9x4x8xf32, #tpu.memory_space<vmem>>, vector<1x4x8xf32>
    %70 = vector.shape_cast %69 : vector<1x4x8xf32> to vector<4x8xf32>
    %cst_64 = arith.constant dense<0.000000e+00> : vector<4x648xf32>
    %71 = tpu.matmul %70, %68, %cst_64 {dimension_numbers = #tpu.dot_dimension_numbers<[1], [0], [0], [1], [0, 0, 1, 1], [], []>} : vector<4x8xf32>, vector<8x648xf32>, vector<4x648xf32> -> vector<4x648xf32>
    %72 = arith.addf %67, %71 : vector<4x648xf32>
    %c0_65 = arith.constant 0 : index
    %c127_66 = arith.constant 127 : index
    %73 = vector.load %arg7[%c0_65, %c127_66] : memref<8x904xf32, #tpu.memory_space<vmem>>, vector<8x648xf32>
    %c3_67 = arith.constant 3 : index
    %c0_68 = arith.constant 0 : index
    %c0_69 = arith.constant 0 : index
    %74 = vector.load %arg3[%c3_67, %c0_68, %c0_69] : memref<9x4x8xf32, #tpu.memory_space<vmem>>, vector<1x4x8xf32>
    %75 = vector.shape_cast %74 : vector<1x4x8xf32> to vector<4x8xf32>
    %cst_70 = arith.constant dense<0.000000e+00> : vector<4x648xf32>
    %76 = tpu.matmul %75, %73, %cst_70 {dimension_numbers = #tpu.dot_dimension_numbers<[1], [0], [0], [1], [0, 0, 1, 1], [], []>} : vector<4x8xf32>, vector<8x648xf32>, vector<4x648xf32> -> vector<4x648xf32>
    %77 = arith.addf %72, %76 : vector<4x648xf32>
    %c0_71 = arith.constant 0 : index
    %c128_72 = arith.constant 128 : index
    %78 = vector.load %arg7[%c0_71, %c128_72] : memref<8x904xf32, #tpu.memory_space<vmem>>, vector<8x648xf32>
    %c4_73 = arith.constant 4 : index
    %c0_74 = arith.constant 0 : index
    %c0_75 = arith.constant 0 : index
    %79 = vector.load %arg3[%c4_73, %c0_74, %c0_75] : memref<9x4x8xf32, #tpu.memory_space<vmem>>, vector<1x4x8xf32>
    %80 = vector.shape_cast %79 : vector<1x4x8xf32> to vector<4x8xf32>
    %cst_76 = arith.constant dense<0.000000e+00> : vector<4x648xf32>
    %81 = tpu.matmul %80, %78, %cst_76 {dimension_numbers = #tpu.dot_dimension_numbers<[1], [0], [0], [1], [0, 0, 1, 1], [], []>} : vector<4x8xf32>, vector<8x648xf32>, vector<4x648xf32> -> vector<4x648xf32>
    %82 = arith.addf %77, %81 : vector<4x648xf32>
    %c0_77 = arith.constant 0 : index
    %c129_78 = arith.constant 129 : index
    %83 = vector.load %arg7[%c0_77, %c129_78] : memref<8x904xf32, #tpu.memory_space<vmem>>, vector<8x648xf32>
    %c5_79 = arith.constant 5 : index
    %c0_80 = arith.constant 0 : index
    %c0_81 = arith.constant 0 : index
    %84 = vector.load %arg3[%c5_79, %c0_80, %c0_81] : memref<9x4x8xf32, #tpu.memory_space<vmem>>, vector<1x4x8xf32>
    %85 = vector.shape_cast %84 : vector<1x4x8xf32> to vector<4x8xf32>
    %cst_82 = arith.constant dense<0.000000e+00> : vector<4x648xf32>
    %86 = tpu.matmul %85, %83, %cst_82 {dimension_numbers = #tpu.dot_dimension_numbers<[1], [0], [0], [1], [0, 0, 1, 1], [], []>} : vector<4x8xf32>, vector<8x648xf32>, vector<4x648xf32> -> vector<4x648xf32>
    %87 = arith.addf %82, %86 : vector<4x648xf32>
    %c0_83 = arith.constant 0 : index
    %c145_84 = arith.constant 145 : index
    %88 = vector.load %arg7[%c0_83, %c145_84] : memref<8x904xf32, #tpu.memory_space<vmem>>, vector<8x648xf32>
    %c6_85 = arith.constant 6 : index
    %c0_86 = arith.constant 0 : index
    %c0_87 = arith.constant 0 : index
    %89 = vector.load %arg3[%c6_85, %c0_86, %c0_87] : memref<9x4x8xf32, #tpu.memory_space<vmem>>, vector<1x4x8xf32>
    %90 = vector.shape_cast %89 : vector<1x4x8xf32> to vector<4x8xf32>
    %cst_88 = arith.constant dense<0.000000e+00> : vector<4x648xf32>
    %91 = tpu.matmul %90, %88, %cst_88 {dimension_numbers = #tpu.dot_dimension_numbers<[1], [0], [0], [1], [0, 0, 1, 1], [], []>} : vector<4x8xf32>, vector<8x648xf32>, vector<4x648xf32> -> vector<4x648xf32>
    %92 = arith.addf %87, %91 : vector<4x648xf32>
    %c0_89 = arith.constant 0 : index
    %c146_90 = arith.constant 146 : index
    %93 = vector.load %arg7[%c0_89, %c146_90] : memref<8x904xf32, #tpu.memory_space<vmem>>, vector<8x648xf32>
    %c7_91 = arith.constant 7 : index
    %c0_92 = arith.constant 0 : index
    %c0_93 = arith.constant 0 : index
    %94 = vector.load %arg3[%c7_91, %c0_92, %c0_93] : memref<9x4x8xf32, #tpu.memory_space<vmem>>, vector<1x4x8xf32>
    %95 = vector.shape_cast %94 : vector<1x4x8xf32> to vector<4x8xf32>
    %cst_94 = arith.constant dense<0.000000e+00> : vector<4x648xf32>
    %96 = tpu.matmul %95, %93, %cst_94 {dimension_numbers = #tpu.dot_dimension_numbers<[1], [0], [0], [1], [0, 0, 1, 1], [], []>} : vector<4x8xf32>, vector<8x648xf32>, vector<4x648xf32> -> vector<4x648xf32>
    %97 = arith.addf %92, %96 : vector<4x648xf32>
    %c0_95 = arith.constant 0 : index
    %c147_96 = arith.constant 147 : index
    %98 = vector.load %arg7[%c0_95, %c147_96] : memref<8x904xf32, #tpu.memory_space<vmem>>, vector<8x648xf32>
    %c8_97 = arith.constant 8 : index
    %c0_98 = arith.constant 0 : index
    %c0_99 = arith.constant 0 : index
    %99 = vector.load %arg3[%c8_97, %c0_98, %c0_99] : memref<9x4x8xf32, #tpu.memory_space<vmem>>, vector<1x4x8xf32>
    %100 = vector.shape_cast %99 : vector<1x4x8xf32> to vector<4x8xf32>
    %cst_100 = arith.constant dense<0.000000e+00> : vector<4x648xf32>
    %101 = tpu.matmul %100, %98, %cst_100 {dimension_numbers = #tpu.dot_dimension_numbers<[1], [0], [0], [1], [0, 0, 1, 1], [], []>} : vector<4x8xf32>, vector<8x648xf32>, vector<4x648xf32> -> vector<4x648xf32>
    %102 = arith.addf %97, %101 : vector<4x648xf32>
    %c0_101 = arith.constant 0 : index
    %c128_102 = arith.constant 128 : index
    %103 = vector.load %arg0[%c0_101, %c128_102] : memref<4x904xf32, #tpu.memory_space<vmem>>, vector<4x648xf32>
    %c0_103 = arith.constant 0 : index
    %c0_104 = arith.constant 0 : index
    %104 = vector.load %arg4[%c0_103, %c0_104] : memref<4x1xf32, #tpu.memory_space<vmem>>, vector<4x1xf32>
    %105 = vector.broadcast %104 : vector<4x1xf32> to vector<4x648xf32>
    %106 = arith.addf %102, %105 : vector<4x648xf32>
    %107 = arith.addf %106, %103 : vector<4x648xf32>
    %c0_105 = arith.constant 0 : index
    %c0_106 = arith.constant 0 : index
    %108 = vector.load %arg6[%c0_105, %c0_106] : memref<4x648xf32, #tpu.memory_space<vmem>>, vector<4x648xf32>
    tpu.vector_store %arg6[%c0_105, %c0_106], %107 {strides = array<i32>} : memref<4x648xf32, #tpu.memory_space<vmem>>, vector<4x648xf32>,
    return
  }
}

</mosaic_0001>

<bundles_post_ra>
// kernel: tile.8
= control target key start
LH: loop header
LB: loop body
LE: loop exit
PB: predicated region body
PF: predicated region fallthrough
CT: control target
= control target key end

     0   :  { %s46_s0 = inlined_call_operand.vmem [shape: f32[324], index: 0, kind: input, shape index: {}]   ;;  %s47_s1 = inlined_call_operand.vmem [shape: f32[2,324], index: 1, kind: output, shape index: {}]  }
   0x1   :  { %v4_v0 = vld [vmem:[%s46_s0] ss:$0 sm:$0xff]  ;;  %v14_v1 = vld [vmem:[%s46_s0 + $0x1] ss:$0 sm:$0xff]  ;;  %v16_v2 = vld [vmem:[%s46_s0 + $0x2] ss:$0 sm:$0xff] }
   0x2   :  { %5 = vst [vmem:[%s47_s1] sm:$0x3] %v4_v0  ;;  %15 = vst [vmem:[%s47_s1 + $0x2] sm:$0x3] %v14_v1 }
   0x3   :  { %17 = vst [vmem:[%s47_s1 + $0x4] sm:$0x3] %v16_v2 }

// kernel: tile.9
= control target key start
LH: loop header
LB: loop body
LE: loop exit
PB: predicated region body
PF: predicated region fallthrough
CT: control target
= control target key end

     0   :  { %vm30_vm0 = vcmask 1042434   ;;  %s20_s12 = smov 3  ;;  %vm32_vm1 = vcmask 490496   ;;  %vm17_vm2 = vcmask 556032   ;;  %s45_s13 = smov 3  ;;  %vm36_vm3 = vcmask 64512   ;;  %s140_s0 = inlined_call_operand.vmem [shape: f32[2,324], index: 0, kind: input, shape index: {}]   ;;  %s141_s1 = inlined_call_operand.vmem [shape: f32[1,648], index: 1, kind: output, shape index: {}]  }
   0x1   :  { %v92_v0 = vld [vmem:[%s140_s0 + $0x4] sm:$0x3]  ;;  %v93_v1 = vld [vmem:[%s140_s0 + $0x2] sm:$0x3]  ;;  %v13_v2 = vld [vmem:[%s140_s0] sm:$0x3] }
   0x2   :  { %8 = vst [vmem:[#allocation1 + $0x10] sm:$0x3] %v92_v0  ;;  %12 = vst [vmem:[#allocation1 + $0x8] sm:$0x3] %v93_v1  ;;  %s26_s0 = smov 3  ;;  %s100_s14 = smov 68  }
   0x3   :  { %14 = vst [vmem:[#allocation1] sm:$0x3] %v13_v2  ;;  %vm39_vm4 = vcmask 1048096  }
   0x9   :  { %v24_v3 = vld [vmem:[#allocation1 + $0x11] sm:$0x1]   ;;  %v29_v5 = vld [vmem:[#allocation1 + $0x7] sm:$0x4]   ;;  %v16_v8 = vld [vmem:[#allocation1 + $0x10] sm:$0x1]  }
   0xa   :  { %v27_v4 = vld [vmem:[#allocation1 + $0x11] ss:$-16 sm:%s26_s0]   ;;  %v21_v7 = vld [vmem:[#allocation1] ss:$8 sm:%s20_s12]   ;;  %19 = vst.msk [vmem:[#allocation0 + $0x10] sm:$0x1] %vm17_vm2, %v16_v8  }
   0xb   :  { %v31_v6 = vsel %vm30_vm0, %v29_v5, %v27_v4  ;;  %22 = vst [vmem:[#allocation0] ss:$8 sm:$0x3] %v21_v7   ;;  %v46_v10 = vld [vmem:[#allocation1 + $0x9] ss:$-8 sm:%s45_s13]  }
   0xc   :  { %v33_v9 = vsel %vm32_vm1, %v31_v6, %v24_v3 }
   0xd   :  { %34 = vrot.lane.b32.xlu0 %v33_v9, %s100_s14 }
  0x11   :  { %47 = vrot.lane.b32.xlu0 %v46_v10, %s100_s14 }
  0x12   :  { %v55_v11 = vld [vmem:[#allocation0] sm:$0x1]  ;;  %v59_v12 = vld [vmem:[#allocation0 + $0x8] sm:$0x1] }
  0x13   :  { %57 = vst [vmem:[%s141_s1] sm:$0x1] %v55_v11  ;;  %94 = vst [vmem:[%s141_s1 + $0x1] sm:$0x1] %v59_v12 }
  0x7f   :  { %v35_v13 = vpop.permute.xlu0 %34  }
  0x80   :  { %38 = vst.msk [vmem:[#allocation0 + $0x28] sm:$0x1] %vm36_vm3, %v35_v13  }
  0x81   :  { %41 = vst.msk [vmem:[#allocation0 + $0x20] ss:$-16 sm:$0x3] %vm39_vm4, %v35_v13   ;;  %43 = vst.msk [vmem:[#allocation0 + $0x16] sm:$0x4] %vm39_vm4, %v35_v13  }
  0x83   :  { %v48_v14 = vpop.permute.xlu0 %47  }
  0x84   :  { %51 = vst.msk [vmem:[#allocation0 + $0x20] ss:$-8 sm:$0x3] %vm17_vm2, %v48_v14  }
  0x87   :  { %v82_v16 = vld [vmem:[#allocation0 + $0x28] sm:$0x1] }
  0x88   :  { %v64_v15 = vld [vmem:[#allocation0 + $0x10] sm:$0x1]  ;;  %98 = vst [vmem:[%s141_s1 + $0x5] sm:$0x1] %v82_v16 }
  0x89   :  { %95 = vst [vmem:[%s141_s1 + $0x2] sm:$0x1] %v64_v15 }
  0x8b   :  { %v70_v17 = vld [vmem:[#allocation0 + $0x18] sm:$0x1]  ;;  %v76_v18 = vld [vmem:[#allocation0 + $0x20] sm:$0x1] }
  0x8c   :  { %96 = vst [vmem:[%s141_s1 + $0x3] sm:$0x1] %v70_v17  ;;  %97 = vst [vmem:[%s141_s1 + $0x4] sm:$0x1] %v76_v18 }

// kernel: _lambda_.1
= control target key start
LH: loop header
LB: loop body
LE: loop exit
PB: predicated region body
PF: predicated region fallthrough
CT: control target
= control target key end

     0   :  { %v4937_v2 = vmov 0.0   ;;  %s4938_s25 = smov 18   ;;  %s4939_s28 = smov 19   ;;  %v4946_v14 = vmov 0   ;;  %vm48_vm0 = vcmask 146432   ;;  %vm58_vm1 = vcmask 1043456   ;;  %s5547_s0 = inlined_call_operand.vmem [shape: f32[4,904], index: 0, kind: input, shape index: {}]   ;;  %s5548_s2 = inlined_call_operand.vmem [shape: f32[8,1], index: 2, kind: input, shape index: {}]   ;;  %s5549_s1 = inlined_call_operand.vmem [shape: f32[9,8,4], index: 1, kind: input, shape index: {}]   ;;  %s5550_s5 = inlined_call_operand.vmem [shape: f32[1,648], index: 5, kind: input, shape index: {}]   ;;  %s5551_s4 = inlined_call_operand.vmem [shape: f32[4,1], index: 4, kind: input, shape index: {}]   ;;  %s5552_s3 = inlined_call_operand.vmem [shape: f32[9,4,8], index: 3, kind: input, shape index: {}]   ;;  %s5553_s6 = inlined_call_operand.vmem [shape: f32[4,648], index: 6, kind: output, shape index: {}]  }
   0x1   :  { %v25_v0 = vld [vmem:[%s5547_s0 + $0x8] sm:$0xff]  ;;  %v24_v1 = vld [vmem:[%s5547_s0] sm:$0xff]  ;;  %135 = vmatprep.mubr.f32.mxu0 %v4937_v2  ;;  %2413 = vst [vmem:[#allocation2] sm:$0xff] %v4937_v2  ;;  %2419 = vst [vmem:[#allocation2 + $0x30] sm:$0xff] %v4937_v2  ;;  %2533 = vmatprep.mubr.f32.mxu1 %v4937_v2  ;;  %s4940_s29 = smov 17   ;;  %s4941_s30 = smov 1  }
   0x2   :  { %40 = vrot.lane.b32.xlu0 %v25_v0, %s4938_s25  ;;  %36 = vrot.lane.b32.xlu1 %v24_v1, %s4938_s25  ;;  %v34_v3 = vcombine.high %v25_v0, %v25_v0  ;;  %v33_v4 = vcombine.high %v24_v1, %v24_v1  ;;  %v26_v5 = vld [vmem:[%s5547_s0 + $0x10] sm:$0xff]  ;;  %v5020_v7 = vld [vmem:[%s5547_s0 + $0x4] sm:$0xff]  ;;  %s4942_s11 = smov 127   ;;  %s4943_s16 = smov 111   ;;  %vm54_vm2 = vcmask 31744   ;;  %vm296_vm3 = vcmask 154624  }
   0x3   :  { %v35_v6 = vcombine.high %v26_v5, %v26_v5  ;;  %v5026_v8 = vcombine.high %v5020_v7, %v5020_v7  ;;  %v796_v9 = vld [vmem:[%s5547_s0 + $0x18] sm:$0xf]  ;;  %v5037_v10 = vld [vmem:[%s5547_s0 + $0xc] sm:$0xff]  ;;  %s4944_s17 = smov 110   ;;  %s4945_s18 = smov 109   ;;  %4925 = vset.pattern.permute.xlu1 %v4946_v14  ;;  %v2358_v15 = vld [vmem:[%s5548_s2] sm:$0xff]  ;;  %4926 = vset.pattern.permute.xlu0 %v4946_v14 }
   0x4   :  { %v5043_v11 = vcombine.high %v5037_v10, %v5037_v10  ;;  %v5050_v12 = vld [vmem:[%s5547_s0 + $0x14] sm:$0xff]  ;;  %v4695_v22 = vld [vmem:[%s5549_s1 + $0x8] sm:$0xff]  ;;  %v27_v34 = vld [vmem:[%s5549_s1] sm:$0xff]  ;;  %vm553_vm4 = vcmask 138240   ;;  %vm820_vm5 = vcmask 7168   ;;  %vm1329_vm6 = vcmask 1039360  }
   0x5   :  { %v5054_v13 = vcombine.high %v5050_v12, %v5050_v12  ;;  %v4714_v46 = vld [vmem:[%s5549_s1 + $0x10] sm:$0xff]  ;;  %v4724_v58 = vld [vmem:[%s5549_s1 + $0x18] sm:$0xff]  ;;  %vm1592_vm7 = vcmask 908288   ;;  %vm1855_vm8 = vcmask 900096   ;;  %vm2118_vm9 = vcmask 891904  }
   0x6   :  { %42 = vrot.lane.b32.xlu1 %v34_v3, %s4938_s25  ;;  %38 = vrot.lane.b32.xlu0 %v33_v4, %s4938_s25  ;;  %vm2420_vm10 = vcmask 64512   ;;  %vm4688_vm11 = vcmask 64516  }
   0x7   :  { %vm4689_vm12 = vmor %vm4688_vm11, %vm58_vm1 }
   0xa   :  { %46 = vrot.lane.b32.xlu1 %v35_v6, %s4938_s25  ;;  %44 = vrot.lane.b32.xlu0 %v26_v5, %s4938_s25 }
   0xe   :  { %288 = vrot.lane.b32.xlu1 %v25_v0, %s4939_s28  ;;  %286 = vrot.lane.b32.xlu0 %v33_v4, %s4939_s28 }
  0x12   :  { %290 = vrot.lane.b32.xlu1 %v34_v3, %s4939_s28  ;;  %284 = vrot.lane.b32.xlu0 %v24_v1, %s4939_s28 }
  0x16   :  { %294 = vrot.lane.b32.xlu1 %v35_v6, %s4939_s28  ;;  %292 = vrot.lane.b32.xlu0 %v26_v5, %s4939_s28 }
  0x1a   :  { %545 = vrot.lane.b32.xlu1 %v25_v0, %s4940_s29  ;;  %543 = vrot.lane.b32.xlu0 %v33_v4, %s4940_s29 }
  0x1e   :  { %547 = vrot.lane.b32.xlu1 %v34_v3, %s4940_s29  ;;  %541 = vrot.lane.b32.xlu0 %v24_v1, %s4940_s29 }
  0x22   :  { %551 = vrot.lane.b32.xlu1 %v35_v6, %s4940_s29  ;;  %549 = vrot.lane.b32.xlu0 %v26_v5, %s4940_s29 }
  0x26   :  { %810 = vrot.lane.b32.xlu1 %v25_v0, %s4941_s30  ;;  %808 = vrot.lane.b32.xlu0 %v33_v4, %s4941_s30 }
  0x2a   :  { %812 = vrot.lane.b32.xlu1 %v34_v3, %s4941_s30  ;;  %806 = vrot.lane.b32.xlu0 %v24_v1, %s4941_s30 }
  0x2e   :  { %816 = vrot.lane.b32.xlu1 %v35_v6, %s4941_s30  ;;  %814 = vrot.lane.b32.xlu0 %v26_v5, %s4941_s30  ;;  %v4734_v6 = vld [vmem:[%s5549_s1 + $0x20] sm:$0xff] }
  0x32   :  { %818 = vrot.lane.b32.xlu0 %v796_v9, %s4941_s30  ;;  %1319 = vrot.lane.b32.xlu1 %v5026_v8, %s4942_s11 }
  0x36   :  { %1317 = vrot.lane.b32.xlu1 %v5020_v7, %s4942_s11  ;;  %1321 = vrot.lane.b32.xlu0 %v5037_v10, %s4942_s11 }
  0x3a   :  { %1325 = vrot.lane.b32.xlu1 %v5050_v12, %s4942_s11  ;;  %1323 = vrot.lane.b32.xlu0 %v5043_v11, %s4942_s11 }
  0x3e   :  { %1582 = vrot.lane.b32.xlu1 %v5026_v8, %s4943_s16  ;;  %1327 = vrot.lane.b32.xlu0 %v5054_v13, %s4942_s11 }
  0x42   :  { %1580 = vrot.lane.b32.xlu1 %v5020_v7, %s4943_s16  ;;  %1584 = vrot.lane.b32.xlu0 %v5037_v10, %s4943_s16 }
  0x46   :  { %1588 = vrot.lane.b32.xlu1 %v5050_v12, %s4943_s16  ;;  %1586 = vrot.lane.b32.xlu0 %v5043_v11, %s4943_s16 }
  0x4a   :  { %1845 = vrot.lane.b32.xlu1 %v5026_v8, %s4944_s17  ;;  %1590 = vrot.lane.b32.xlu0 %v5054_v13, %s4943_s16 }
  0x4e   :  { %1843 = vrot.lane.b32.xlu1 %v5020_v7, %s4944_s17  ;;  %1847 = vrot.lane.b32.xlu0 %v5037_v10, %s4944_s17 }
  0x52   :  { %1851 = vrot.lane.b32.xlu1 %v5050_v12, %s4944_s17  ;;  %1849 = vrot.lane.b32.xlu0 %v5043_v11, %s4944_s17 }
  0x56   :  { %2108 = vrot.lane.b32.xlu1 %v5026_v8, %s4945_s18  ;;  %1853 = vrot.lane.b32.xlu0 %v5054_v13, %s4944_s17 }
  0x5a   :  { %2106 = vrot.lane.b32.xlu1 %v5020_v7, %s4945_s18  ;;  %2110 = vrot.lane.b32.xlu0 %v5037_v10, %s4945_s18 }
  0x5e   :  { %2112 = vrot.lane.b32.xlu0 %v5043_v11, %s4945_s18  ;;  %2114 = vrot.lane.b32.xlu1 %v5050_v12, %s4945_s18 }
  0x62   :  { %2116 = vrot.lane.b32.xlu0 %v5054_v13, %s4945_s18  ;;  %2361 = vperm.xlu1 %4925, %v2358_v15  }
  0x66   :  { %2443 = vrot.lane.b32.xlu0 %v4937_v2, %s4938_s25 }
  0x74   :  { %v41_v16 = vpop.permute.xlu0 %40  ;;  %v37_v17 = vpop.permute.xlu1 %36 }
  0x78   :  { %v43_v18 = vpop.permute.xlu1 %42  ;;  %v39_v19 = vpop.permute.xlu0 %38 }
  0x79   :  { %v50_v20 = vsel %vm48_vm0, %v39_v19, %v41_v16  ;;  %v49_v21 = vsel %vm48_vm0, %v37_v17, %v39_v19  ;;  %v51_v26 = vsel %vm48_vm0, %v41_v16, %v43_v18 }
  0x7a   :  { %4696 = vmatprep.subr.msk.mxu0 %vm58_vm1, %v50_v20 }
  0x7b   :  { %4697 = vmatpush1.msk.msra.mxu0 %vm58_vm1, %v49_v21 }
  0x7c   :  { %v47_v23 = vpop.permute.xlu1 %46  ;;  %4698 = vmatmul.mubr.msk.f32.vlgmr.msra.gmra.mrb[0].mxu0 %vm54_vm2, %v4695_v22  ;;  %v45_v24 = vpop.permute.xlu0 %44 }
  0x7d   :  { %v52_v25 = vsel %vm48_vm0, %v43_v18, %v45_v24  ;;  %206 = vmatprep.mubr.f32.mxu0 %v4937_v2  ;;  %v53_v27 = vsel %vm48_vm0, %v45_v24, %v47_v23 }
  0x7e   :  { %4699 = vmatprep.subr.msk.mxu0 %vm58_vm1, %v52_v25 }
  0x7f   :  { %4700 = vmatpush1.msk.msra.mxu0 %vm58_vm1, %v51_v26 }
  0x80   :  { %v289_v28 = vpop.permute.xlu1 %288  ;;  %4701 = vmatmul.mubr.msk.f32.vlgmr.msra.gmra.mrb[2].mxu0 %vm54_vm2, %v4695_v22  ;;  %4702 = vmatprep.subr.msk.mxu0 %vm58_vm1, %v47_v23  ;;  %v287_v29 = vpop.permute.xlu0 %286 }
  0x81   :  { %v298_v30 = vsel %vm296_vm3, %v287_v29, %v289_v28  ;;  %4703 = vmatpush1.msk.msra.mxu0 %vm58_vm1, %v53_v27  ;;  %277 = vmatprep.mubr.f32.mxu0 %v4937_v2 }
  0x82   :  { %4705 = vmatprep.subr.msk.mxu0 %vm58_vm1, %v298_v30 }
  0x84   :  { %v291_v31 = vpop.permute.xlu1 %290  ;;  %4704 = vmatmul.mubr.msk.f32.vlgmr.msra.gmra.mrb[4].mxu0 %vm54_vm2, %v4695_v22  ;;  %v285_v32 = vpop.permute.xlu0 %284 }
  0x85   :  { %v297_v33 = vsel %vm296_vm3, %v285_v32, %v287_v29  ;;  %381 = vmatprep.mubr.f32.mxu0 %v4937_v2  ;;  %v299_v38 = vsel %vm296_vm3, %v289_v28, %v291_v31  ;;  %v4754_v28 = vld [vmem:[%s5549_s1 + $0x30] sm:$0xff] }
  0x86   :  { %4706 = vmatpush1.msk.msra.mxu0 %vm58_vm1, %v297_v33 }
  0x88   :  { %v295_v35 = vpop.permute.xlu1 %294  ;;  %4707 = vmatmul.mubr.msk.f32.vlgmr.msra.gmra.mrb[0].mxu0 %vm54_vm2, %v27_v34  ;;  %v293_v36 = vpop.permute.xlu0 %292 }
  0x89   :  { %v300_v37 = vsel %vm296_vm3, %v291_v31, %v293_v36  ;;  %452 = vmatprep.mubr.f32.mxu0 %v4937_v2  ;;  %v301_v39 = vsel %vm296_vm3, %v293_v36, %v295_v35 }
  0x8a   :  { %4708 = vmatprep.subr.msk.mxu0 %vm58_vm1, %v300_v37 }
  0x8b   :  { %4709 = vmatpush1.msk.msra.mxu0 %vm58_vm1, %v299_v38  ;;  %v4764_v38 = vld [vmem:[%s5549_s1 + $0x38] sm:$0xff] }
  0x8c   :  { %v546_v40 = vpop.permute.xlu1 %545  ;;  %4710 = vmatmul.mubr.msk.f32.vlgmr.msra.gmra.mrb[2].mxu0 %vm54_vm2, %v27_v34  ;;  %4711 = vmatprep.subr.msk.mxu0 %vm58_vm1, %v295_v35  ;;  %v544_v41 = vpop.permute.xlu0 %543 }
  0x8d   :  { %v555_v42 = vsel %vm553_vm4, %v544_v41, %v546_v40  ;;  %4712 = vmatpush1.msk.msra.mxu0 %vm58_vm1, %v301_v39  ;;  %523 = vmatprep.mubr.f32.mxu0 %v4937_v2 }
  0x8e   :  { %4715 = vmatprep.subr.msk.mxu0 %vm58_vm1, %v555_v42 }
  0x90   :  { %v548_v43 = vpop.permute.xlu1 %547  ;;  %4713 = vmatmul.mubr.msk.f32.vlgmr.msra.gmra.mrb[4].mxu0 %vm54_vm2, %v27_v34  ;;  %v542_v44 = vpop.permute.xlu0 %541 }
  0x91   :  { %v554_v45 = vsel %vm553_vm4, %v542_v44, %v544_v41  ;;  %638 = vmatprep.mubr.f32.mxu0 %v4937_v2  ;;  %v556_v50 = vsel %vm553_vm4, %v546_v40, %v548_v43 }
  0x92   :  { %4716 = vmatpush1.msk.msra.mxu0 %vm58_vm1, %v554_v45 }
  0x94   :  { %v552_v47 = vpop.permute.xlu1 %551  ;;  %4717 = vmatmul.mubr.msk.f32.vlgmr.msra.gmra.mrb[0].mxu0 %vm54_vm2, %v4714_v46  ;;  %v550_v48 = vpop.permute.xlu0 %549 }
  0x95   :  { %v557_v49 = vsel %vm553_vm4, %v548_v43, %v550_v48  ;;  %709 = vmatprep.mubr.f32.mxu0 %v4937_v2  ;;  %v558_v51 = vsel %vm553_vm4, %v550_v48, %v552_v47  ;;  %v4774_v48 = vld [vmem:[%s5549_s1 + $0x40] sm:$0xff] }
  0x96   :  { %4718 = vmatprep.subr.msk.mxu0 %vm58_vm1, %v557_v49 }
  0x97   :  { %4719 = vmatpush1.msk.msra.mxu0 %vm58_vm1, %v556_v50 }
  0x98   :  { %v811_v52 = vpop.permute.xlu1 %810  ;;  %4720 = vmatmul.mubr.msk.f32.vlgmr.msra.gmra.mrb[2].mxu0 %vm54_vm2, %v4714_v46  ;;  %4721 = vmatprep.subr.msk.mxu0 %vm58_vm1, %v552_v47  ;;  %v809_v53 = vpop.permute.xlu0 %808 }
  0x99   :  { %v822_v54 = vsel %vm820_vm5, %v809_v53, %v811_v52  ;;  %4722 = vmatpush1.msk.msra.mxu0 %vm58_vm1, %v558_v51  ;;  %780 = vmatprep.mubr.f32.mxu0 %v4937_v2 }
  0x9a   :  { %4725 = vmatprep.subr.msk.mxu0 %vm58_vm1, %v822_v54 }
  0x9c   :  { %v813_v55 = vpop.permute.xlu1 %812  ;;  %4723 = vmatmul.mubr.msk.f32.vlgmr.msra.gmra.mrb[4].mxu0 %vm54_vm2, %v4714_v46  ;;  %v807_v56 = vpop.permute.xlu0 %806 }
  0x9d   :  { %v821_v57 = vsel %vm820_vm5, %v807_v56, %v809_v53  ;;  %906 = vmatprep.mubr.f32.mxu0 %v4937_v2  ;;  %v823_v62 = vsel %vm820_vm5, %v811_v52, %v813_v55  ;;  %v2377_v52 = vlaneseq  ;;  %v23_v56 = vld [vmem:[%s5550_s5] sm:$0x3f] }
  0x9e   :  { %4726 = vmatpush1.msk.msra.mxu0 %vm58_vm1, %v821_v57 }
  0x9f   :  { %v2378_v53 = vshrl.u32 %v2377_v52, 7 }
  0xa0   :  { %v817_v59 = vpop.permute.xlu1 %816  ;;  %4727 = vmatmul.mubr.msk.f32.vlgmr.msra.gmra.mrb[0].mxu0 %vm54_vm2, %v4724_v58  ;;  %v815_v60 = vpop.permute.xlu0 %814 }
  0xa1   :  { %v824_v61 = vsel %vm820_vm5, %v813_v55, %v815_v60  ;;  %977 = vmatprep.mubr.f32.mxu0 %v4937_v2  ;;  %v825_v3 = vsel %vm820_vm5, %v815_v60, %v817_v59  ;;  %v2379_v54 = vsub.s32 0, %v2378_v53  ;;  %v2383_v57 = vsub.s32 1, %v2378_v53 }
  0xa2   :  { %4728 = vmatprep.subr.msk.mxu0 %vm58_vm1, %v824_v61 }
  0xa3   :  { %4729 = vmatpush1.msk.msra.mxu0 %vm58_vm1, %v823_v62  ;;  %v2380_v60 = vrot.slane %v23_v56, %v2379_v54  ;;  %v2387_v62 = vsub.s32 2, %v2378_v53 }
  0xa4   :  { %4730 = vmatmul.mubr.msk.f32.vlgmr.msra.gmra.mrb[2].mxu0 %vm54_vm2, %v4724_v58  ;;  %v819_v63 = vpop.permute.xlu0 %818  ;;  %v1320_v0 = vpop.permute.xlu1 %1319 }
  0xa5   :  { %v826_v1 = vsel %vm820_vm5, %v817_v59, %v819_v63  ;;  %1048 = vmatprep.mubr.f32.mxu0 %v4937_v2 }
  0xa6   :  { %4731 = vmatprep.subr.msk.mxu0 %vm58_vm1, %v826_v1  ;;  %v2391_v1 = vsub.s32 3, %v2378_v53 }
  0xa7   :  { %4732 = vmatpush1.msk.msra.mxu0 %vm58_vm1, %v825_v3 }
  0xa8   :  { %4733 = vmatmul.mubr.msk.f32.vlgmr.msra.gmra.mrb[4].mxu0 %vm54_vm2, %v4724_v58  ;;  %4735 = vmatprep.subr.msk.mxu0 %vm58_vm1, %v5026_v8  ;;  %v1318_v4 = vpop.permute.xlu1 %1317  ;;  %v1322_v5 = vpop.permute.xlu0 %1321 }
  0xa9   :  { %4736 = vmatpush1.msk.msra.mxu0 %vm58_vm1, %v5020_v7  ;;  %1151 = vmatprep.mubr.f32.mxu0 %v4937_v2  ;;  %v1331_v7 = vsel %vm1329_vm6, %v1320_v0, %v1322_v5 }
  0xaa   :  { %4738 = vmatprep.subr.msk.mxu0 %vm58_vm1, %v5043_v11  ;;  %v1330_v11 = vsel %vm1329_vm6, %v1318_v4, %v1320_v0  ;;  %v2384_v0 = vrot.slane %v23_v56, %v2383_v57 }
  0xac   :  { %4737 = vmatmul.mubr.msk.f32.vlgmr.msra.gmra.mrb[0].mxu0 %vm54_vm2, %v4734_v6  ;;  %v1326_v9 = vpop.permute.xlu1 %1325  ;;  %v1324_v14 = vpop.permute.xlu0 %1323 }
  0xad   :  { %4739 = vmatpush1.msk.msra.mxu0 %vm58_vm1, %v5037_v10  ;;  %1222 = vmatprep.mubr.f32.mxu0 %v4937_v2  ;;  %v1333_v10 = vsel %vm1329_vm6, %v1324_v14, %v1326_v9  ;;  %v1332_v17 = vsel %vm1329_vm6, %v1322_v5, %v1324_v14  ;;  %v2388_v14 = vrot.slane %v23_v56, %v2387_v62 }
  0xae   :  { %4741 = vmatprep.subr.msk.mxu0 %vm58_vm1, %v5054_v13 }
  0xb0   :  { %4740 = vmatmul.mubr.msk.f32.vlgmr.msra.gmra.mrb[2].mxu0 %vm54_vm2, %v4734_v6  ;;  %v1583_v8 = vpop.permute.xlu1 %1582  ;;  %v1328_v15 = vpop.permute.xlu0 %1327 }
  0xb1   :  { %4742 = vmatpush1.msk.msra.mxu0 %vm58_vm1, %v5050_v12  ;;  %1293 = vmatprep.mubr.f32.mxu0 %v4937_v2  ;;  %v4744_v12 = vld [vmem:[%s5549_s1 + $0x28] sm:$0xff]  ;;  %v1334_v21 = vsel %vm1329_vm6, %v1326_v9, %v1328_v15 }
  0xb2   :  { %4745 = vmatprep.subr.msk.mxu0 %vm58_vm1, %v1331_v7 }
  0xb4   :  { %4743 = vmatmul.mubr.msk.f32.vlgmr.msra.gmra.mrb[4].mxu0 %vm54_vm2, %v4734_v6  ;;  %v1581_v13 = vpop.permute.xlu1 %1580  ;;  %v1585_v16 = vpop.permute.xlu0 %1584 }
  0xb5   :  { %4746 = vmatpush1.msk.msra.mxu0 %vm58_vm1, %v1330_v11  ;;  %1414 = vmatprep.mubr.f32.mxu0 %v4937_v2  ;;  %v1594_v20 = vsel %vm1592_vm7, %v1583_v8, %v1585_v16  ;;  %v1593_v25 = vsel %vm1592_vm7, %v1581_v13, %v1583_v8  ;;  %v2395_v8 = vsub.s32 4, %v2378_v53  ;;  %v2392_v11 = vrot.slane %v23_v56, %v2391_v1 }
  0xb6   :  { %4748 = vmatprep.subr.msk.mxu0 %vm58_vm1, %v1333_v10  ;;  %v2399_v13 = vsub.s32 5, %v2378_v53 }
  0xb8   :  { %4747 = vmatmul.mubr.msk.f32.vlgmr.msra.gmra.mrb[0].mxu0 %vm54_vm2, %v4744_v12  ;;  %v1589_v18 = vpop.permute.xlu1 %1588  ;;  %v1587_v19 = vpop.permute.xlu0 %1586 }
  0xb9   :  { %4749 = vmatpush1.msk.msra.mxu0 %vm58_vm1, %v1332_v17  ;;  %1485 = vmatprep.mubr.f32.mxu0 %v4937_v2  ;;  %v1596_v24 = vsel %vm1592_vm7, %v1587_v19, %v1589_v18  ;;  %v1595_v29 = vsel %vm1592_vm7, %v1585_v16, %v1587_v19 }
  0xba   :  { %4751 = vmatprep.subr.msk.mxu0 %vm58_vm1, %v1328_v15 }
  0xbc   :  { %4750 = vmatmul.mubr.msk.f32.vlgmr.msra.gmra.mrb[2].mxu0 %vm54_vm2, %v4744_v12  ;;  %v1846_v22 = vpop.permute.xlu1 %1845  ;;  %v1591_v23 = vpop.permute.xlu0 %1590 }
  0xbd   :  { %4752 = vmatpush1.msk.msra.mxu0 %vm58_vm1, %v1334_v21  ;;  %1556 = vmatprep.mubr.f32.mxu0 %v4937_v2  ;;  %v1597_v33 = vsel %vm1592_vm7, %v1589_v18, %v1591_v23 }
  0xbe   :  { %4755 = vmatprep.subr.msk.mxu0 %vm58_vm1, %v1594_v20  ;;  %v2396_v20 = vrot.slane %v23_v56, %v2395_v8  ;;  %v4795_v8 = vld [vmem:[%s5552_s3 + $0xc] sm:$0xf] }
  0xc0   :  { %4753 = vmatmul.mubr.msk.f32.vlgmr.msra.gmra.mrb[4].mxu0 %vm54_vm2, %v4744_v12  ;;  %v1844_v26 = vpop.permute.xlu1 %1843  ;;  %v1848_v27 = vpop.permute.xlu0 %1847 }
  0xc1   :  { %4756 = vmatpush1.msk.msra.mxu0 %vm58_vm1, %v1593_v25  ;;  %1677 = vmatprep.mubr.f32.mxu0 %v4937_v2  ;;  %v1857_v32 = vsel %vm1855_vm8, %v1846_v22, %v1848_v27  ;;  %v1856_v37 = vsel %vm1855_vm8, %v1844_v26, %v1846_v22 }
  0xc2   :  { %4758 = vmatprep.subr.msk.mxu0 %vm58_vm1, %v1596_v24  ;;  %v2400_v24 = vrot.slane %v23_v56, %v2399_v13 }
  0xc4   :  { %4757 = vmatmul.mubr.msk.f32.vlgmr.msra.gmra.mrb[0].mxu0 %vm54_vm2, %v4754_v28  ;;  %v1852_v30 = vpop.permute.xlu1 %1851  ;;  %v1850_v31 = vpop.permute.xlu0 %1849 }
  0xc5   :  { %4759 = vmatpush1.msk.msra.mxu0 %vm58_vm1, %v1595_v29  ;;  %1748 = vmatprep.mubr.f32.mxu0 %v4937_v2  ;;  %v1859_v36 = vsel %vm1855_vm8, %v1850_v31, %v1852_v30  ;;  %v1858_v41 = vsel %vm1855_vm8, %v1848_v27, %v1850_v31 }
  0xc6   :  { %4761 = vmatprep.subr.msk.mxu0 %vm58_vm1, %v1591_v23 }
  0xc8   :  { %4760 = vmatmul.mubr.msk.f32.vlgmr.msra.gmra.mrb[2].mxu0 %vm54_vm2, %v4754_v28  ;;  %v2109_v34 = vpop.permute.xlu1 %2108  ;;  %v1854_v35 = vpop.permute.xlu0 %1853 }
  0xc9   :  { %4762 = vmatpush1.msk.msra.mxu0 %vm58_vm1, %v1597_v33  ;;  %1819 = vmatprep.mubr.f32.mxu0 %v4937_v2  ;;  %v1860_v43 = vsel %vm1855_vm8, %v1852_v30, %v1854_v35  ;;  %v4647_v30 = vld [vmem:[%s5551_s4] sm:$0xf] }
  0xca   :  { %4765 = vmatprep.subr.msk.mxu0 %vm58_vm1, %v1857_v32 }
  0xcc   :  { %4763 = vmatmul.mubr.msk.f32.vlgmr.msra.gmra.mrb[4].mxu0 %vm54_vm2, %v4754_v28  ;;  %v2107_v39 = vpop.permute.xlu1 %2106  ;;  %v2111_v40 = vpop.permute.xlu0 %2110 }
  0xcd   :  { %4766 = vmatpush1.msk.msra.mxu0 %vm58_vm1, %v1856_v37  ;;  %1940 = vmatprep.mubr.f32.mxu0 %v4937_v2  ;;  %v2120_v42 = vsel %vm2118_vm9, %v2109_v34, %v2111_v40  ;;  %v2119_v47 = vsel %vm2118_vm9, %v2107_v39, %v2109_v34 }
  0xce   :  { %4768 = vmatprep.subr.msk.mxu0 %vm58_vm1, %v1859_v36 }
  0xd0   :  { %4767 = vmatmul.mubr.msk.f32.vlgmr.msra.gmra.mrb[0].mxu0 %vm54_vm2, %v4764_v38  ;;  %v2113_v44 = vpop.permute.xlu0 %2112  ;;  %v2115_v45 = vpop.permute.xlu1 %2114 }
  0xd1   :  { %4769 = vmatpush1.msk.msra.mxu0 %vm58_vm1, %v1858_v41  ;;  %2011 = vmatprep.mubr.f32.mxu0 %v4937_v2  ;;  %v2122_v46 = vsel %vm2118_vm9, %v2113_v44, %v2115_v45  ;;  %v2121_v49 = vsel %vm2118_vm9, %v2111_v40, %v2113_v44 }
  0xd2   :  { %4771 = vmatprep.subr.msk.mxu0 %vm58_vm1, %v1854_v35  ;;  %v4784_v35 = vld [vmem:[%s5552_s3 + $0x4] sm:$0xf] }
  0xd4   :  { %4770 = vmatmul.mubr.msk.f32.vlgmr.msra.gmra.mrb[2].mxu0 %vm54_vm2, %v4764_v38  ;;  %v2117_v50 = vpop.permute.xlu0 %2116 }
  0xd5   :  { %4772 = vmatpush1.msk.msra.mxu0 %vm58_vm1, %v1860_v43  ;;  %2082 = vmatprep.mubr.f32.mxu0 %v4937_v2  ;;  %v2123_v51 = vsel %vm2118_vm9, %v2115_v45, %v2117_v50 }
  0xd6   :  { %4775 = vmatprep.subr.msk.mxu0 %vm58_vm1, %v2120_v42 }
  0xd8   :  { %4773 = vmatmul.mubr.msk.f32.vlgmr.msra.gmra.mrb[4].mxu0 %vm54_vm2, %v4764_v38  ;;  %v2444_v31 = vpop.permute.xlu0 %2443 }
  0xd9   :  { %4776 = vmatpush1.msk.msra.mxu0 %vm58_vm1, %v2119_v47  ;;  %2203 = vmatprep.mubr.f32.mxu0 %v4937_v2 }
  0xda   :  { %4778 = vmatprep.subr.msk.mxu0 %vm58_vm1, %v2122_v46 }
  0xdc   :  { %4777 = vmatmul.mubr.msk.f32.vlgmr.msra.gmra.mrb[0].mxu0 %vm54_vm2, %v4774_v48 }
  0xdd   :  { %4779 = vmatpush1.msk.msra.mxu0 %vm58_vm1, %v2121_v49  ;;  %2274 = vmatprep.mubr.f32.mxu0 %v4937_v2 }
  0xde   :  { %4781 = vmatprep.subr.msk.mxu0 %vm58_vm1, %v2117_v50 }
  0xe0   :  { %4780 = vmatmul.mubr.msk.f32.vlgmr.msra.gmra.mrb[2].mxu0 %vm54_vm2, %v4774_v48 }
  0xe1   :  { %4782 = vmatpush1.msk.msra.mxu0 %vm58_vm1, %v2123_v51  ;;  %2345 = vmatprep.mubr.f32.mxu0 %v4937_v2  ;;  %v2362_v55 = vpop.permute.xlu1 %2361 }
  0xe4   :  { %4783 = vmatmul.mubr.msk.f32.vlgmr.msra.gmra.mrb[4].mxu0 %vm54_vm2, %v4774_v48  ;;  %v2434_v48 = vld [vmem:[%s5552_s3] sm:$0xf] }
 0x1af   :  { %v2205_v58 = vpop.f32.mrb[0].mxu0 }
 0x1b0   :  { %v2364_v59 = vadd.f32 %v2362_v55, %v2205_v58  ;;  %v2207_v61 = vpop.f32.mrb[1].mxu0 }
 0x1b1   :  { %v2365_v63 = vadd.f32 %v2362_v55, %v2207_v61 }
 0x1b2   :  { %v2370_v3 = vmax.f32 %v2364_v59, 0.0 }
 0x1b3   :  { %v2371_v4 = vmax.f32 %v2365_v63, 0.0  ;;  %v2276_v5 = vpop.f32.mrb[2].mxu0 }
 0x1b4   :  { %v5287_v6 = vmul.f32 %v2380_v60, %v2370_v3  ;;  %v2366_v9 = vadd.f32 %v2362_v55, %v2276_v5  ;;  %v2278_v7 = vpop.f32.mrb[3].mxu0  ;;  %v4791_v60 = vld [vmem:[%s5552_s3 + $0x8] sm:$0xf] }
 0x1b5   :  { %v5289_v15 = vmul.f32 %v2384_v0, %v2371_v4  ;;  %v2367_v10 = vadd.f32 %v2362_v55, %v2278_v7 }
 0x1b6   :  { %v2372_v16 = vmax.f32 %v2366_v9, 0.0  ;;  %2445 = vrot.lane.b32.xlu0 %v5287_v6, %s4938_s25 }
 0x1b7   :  { %v2373_v12 = vmax.f32 %v2367_v10, 0.0  ;;  %v2347_v17 = vpop.f32.mrb[4].mxu0  ;;  %2447 = vrot.lane.b32.xlu1 %v5289_v15, %s4938_s25 }
 0x1b8   :  { %v5295_v18 = vmul.f32 %v2388_v14, %v2372_v16  ;;  %v2368_v19 = vadd.f32 %v2362_v55, %v2347_v17  ;;  %v2349_v21 = vpop.f32.mrb[5].mxu0 }
 0x1b9   :  { %v5297_v22 = vmul.f32 %v2392_v11, %v2373_v12  ;;  %v2369_v23 = vadd.f32 %v2362_v55, %v2349_v21 }
 0x1ba   :  { %v2374_v25 = vmax.f32 %v2368_v19, 0.0 }
 0x1bb   :  { %v2375_v26 = vmax.f32 %v2369_v23, 0.0  ;;  %2449 = vrot.lane.b32.xlu1 %v5295_v18, %s4938_s25  ;;  %2451 = vrot.lane.b32.xlu0 %v5297_v22, %s4938_s25 }
 0x1bc   :  { %v5303_v27 = vmul.f32 %v2396_v20, %v2374_v25 }
 0x1bd   :  { %v2412_v28 = vmul.f32 %v2400_v24, %v2375_v26  ;;  %v4799_v24 = vld [vmem:[%s5552_s3 + $0x10] sm:$0xf] }
 0x1bf   :  { %2427 = vst.msk [vmem:[#allocation2 + $0x30] sm:$0xff] %vm2420_vm10, %v2412_v28  ;;  %2684 = vrot.lane.b32.xlu0 %v5287_v6, %s4939_s28  ;;  %2453 = vrot.lane.b32.xlu1 %v5303_v27, %s4938_s25 }
 0x1c3   :  { %2682 = vrot.lane.b32.xlu0 %v4937_v2, %s4939_s28  ;;  %2686 = vrot.lane.b32.xlu1 %v5289_v15, %s4939_s28 }
 0x1c6   :  { %v5342_v29 = vld [vmem:[#allocation2 + $0x30] sm:$0xff] }
 0x1c7   :  { %2690 = vrot.lane.b32.xlu0 %v5297_v22, %s4939_s28  ;;  %2688 = vrot.lane.b32.xlu1 %v5295_v18, %s4939_s28 }
 0x1cb   :  { %2925 = vrot.lane.b32.xlu0 %v5287_v6, %s4940_s29  ;;  %2692 = vrot.lane.b32.xlu1 %v5303_v27, %s4939_s28 }
 0x1cf   :  { %2923 = vrot.lane.b32.xlu0 %v4937_v2, %s4940_s29  ;;  %2927 = vrot.lane.b32.xlu1 %v5289_v15, %s4940_s29 }
 0x1d3   :  { %2931 = vrot.lane.b32.xlu0 %v5297_v22, %s4940_s29  ;;  %2929 = vrot.lane.b32.xlu1 %v5295_v18, %s4940_s29 }
 0x1d7   :  { %3186 = vrot.lane.b32.xlu0 %v5287_v6, %s4941_s30  ;;  %2933 = vrot.lane.b32.xlu1 %v5303_v27, %s4940_s29 }
 0x1db   :  { %3184 = vrot.lane.b32.xlu0 %v4937_v2, %s4941_s30  ;;  %3188 = vrot.lane.b32.xlu1 %v5289_v15, %s4941_s30 }
 0x1df   :  { %3192 = vrot.lane.b32.xlu0 %v5297_v22, %s4941_s30  ;;  %3190 = vrot.lane.b32.xlu1 %v5295_v18, %s4941_s30 }
 0x1e3   :  { %3194 = vrot.lane.b32.xlu1 %v5303_v27, %s4941_s30  ;;  %3196 = vrot.lane.b32.xlu0 %v5342_v29, %s4941_s30 }
 0x1e7   :  { %3660 = vrot.lane.b32.xlu1 %v5289_v15, %s4942_s11  ;;  %3662 = vrot.lane.b32.xlu0 %v5295_v18, %s4942_s11 }
 0x1eb   :  { %3658 = vrot.lane.b32.xlu1 %v5287_v6, %s4942_s11  ;;  %3664 = vrot.lane.b32.xlu0 %v5297_v22, %s4942_s11 }
 0x1ef   :  { %3666 = vrot.lane.b32.xlu1 %v5303_v27, %s4942_s11  ;;  %3668 = vrot.lane.b32.xlu0 %v5342_v29, %s4942_s11 }
 0x1f3   :  { %3907 = vrot.lane.b32.xlu1 %v5289_v15, %s4943_s16  ;;  %3909 = vrot.lane.b32.xlu0 %v5295_v18, %s4943_s16 }
 0x1f7   :  { %3905 = vrot.lane.b32.xlu1 %v5287_v6, %s4943_s16  ;;  %3911 = vrot.lane.b32.xlu0 %v5297_v22, %s4943_s16 }
 0x1fb   :  { %3913 = vrot.lane.b32.xlu1 %v5303_v27, %s4943_s16  ;;  %3915 = vrot.lane.b32.xlu0 %v5342_v29, %s4943_s16 }
 0x1ff   :  { %4154 = vrot.lane.b32.xlu1 %v5289_v15, %s4944_s17  ;;  %4156 = vrot.lane.b32.xlu0 %v5295_v18, %s4944_s17 }
 0x203   :  { %4152 = vrot.lane.b32.xlu1 %v5287_v6, %s4944_s17  ;;  %4158 = vrot.lane.b32.xlu0 %v5297_v22, %s4944_s17 }
 0x207   :  { %4160 = vrot.lane.b32.xlu1 %v5303_v27, %s4944_s17  ;;  %4162 = vrot.lane.b32.xlu0 %v5342_v29, %s4944_s17 }
 0x20b   :  { %4401 = vrot.lane.b32.xlu1 %v5289_v15, %s4945_s18  ;;  %4403 = vrot.lane.b32.xlu0 %v5295_v18, %s4945_s18 }
 0x20f   :  { %4399 = vrot.lane.b32.xlu1 %v5287_v6, %s4945_s18  ;;  %4405 = vrot.lane.b32.xlu0 %v5297_v22, %s4945_s18 }
 0x213   :  { %4407 = vrot.lane.b32.xlu1 %v5303_v27, %s4945_s18  ;;  %4409 = vrot.lane.b32.xlu0 %v5342_v29, %s4945_s18 }
 0x217   :  { %4650 = vperm.xlu1 %4925, %v4647_v30  }
 0x228   :  { %v2446_v32 = vpop.permute.xlu0 %2445 }
 0x229   :  { %v2448_v33 = vpop.permute.xlu1 %2447  ;;  %v2455_v36 = vsel %vm48_vm0, %v2444_v31, %v2446_v32  ;;  %v5473_v31 = vld [vmem:[#allocation2] sm:$0xff] }
 0x22a   :  { %v2456_v34 = vsel %vm48_vm0, %v2446_v32, %v2448_v33 }
 0x22b   :  { %2469 = vmatprep.subr.mxu1 %v2456_v34 }
 0x22c   :  { %2470 = vmatpush1.msra.mxu1 %v2455_v36 }
 0x22d   :  { %v2450_v37 = vpop.permute.xlu1 %2449  ;;  %4785 = vmatmul.mubr.msk.f32.vlgmr.msra.gmra.mrb[0].mxu1 %vm2420_vm10, %v4784_v35  ;;  %v2452_v38 = vpop.permute.xlu0 %2451 }
 0x22e   :  { %v2457_v39 = vsel %vm48_vm0, %v2448_v33, %v2450_v37  ;;  %v2458_v40 = vsel %vm48_vm0, %v2450_v37, %v2452_v38  ;;  %2604 = vmatprep.mubr.f32.mxu1 %v4937_v2 }
 0x22f   :  { %2540 = vmatprep.subr.mxu1 %v2458_v40 }
 0x230   :  { %2541 = vmatpush1.msra.mxu1 %v2457_v39 }
 0x231   :  { %v2454_v41 = vpop.permute.xlu1 %2453  ;;  %4786 = vmatmul.mubr.msk.f32.vlgmr.msra.gmra.mrb[2].mxu1 %vm2420_vm10, %v4784_v35  ;;  %v2685_v42 = vpop.permute.xlu0 %2684 }
 0x232   :  { %v2459_v43 = vsel %vm48_vm0, %v2452_v38, %v2454_v41  ;;  %2611 = vmatprep.subr.mxu1 %v2454_v41  ;;  %2675 = vmatprep.mubr.f32.mxu1 %v4937_v2 }
 0x233   :  { %2612 = vmatpush1.msra.mxu1 %v2459_v43 }
 0x235   :  { %v2687_v44 = vpop.permute.xlu1 %2686  ;;  %4787 = vmatmul.mubr.msk.f32.vlgmr.msra.gmra.mrb[4].mxu1 %vm2420_vm10, %v4784_v35  ;;  %v2683_v45 = vpop.permute.xlu0 %2682 }
 0x236   :  { %v2694_v46 = vsel %vm296_vm3, %v2683_v45, %v2685_v42  ;;  %v2695_v47 = vsel %vm296_vm3, %v2685_v42, %v2687_v44  ;;  %2772 = vmatprep.mubr.f32.mxu1 %v4937_v2  ;;  %v4807_v42 = vld [vmem:[%s5552_s3 + $0x18] sm:$0xf] }
 0x237   :  { %2708 = vmatprep.subr.mxu1 %v2695_v47 }
 0x238   :  { %2709 = vmatpush1.msra.mxu1 %v2694_v46 }
 0x239   :  { %v2689_v49 = vpop.permute.xlu1 %2688  ;;  %4788 = vmatmul.mubr.msk.f32.vlgmr.msra.gmra.mrb[0].mxu1 %vm2420_vm10, %v2434_v48  ;;  %v2691_v50 = vpop.permute.xlu0 %2690 }
 0x23a   :  { %v2696_v51 = vsel %vm296_vm3, %v2687_v44, %v2689_v49  ;;  %v2697_v52 = vsel %vm296_vm3, %v2689_v49, %v2691_v50  ;;  %2843 = vmatprep.mubr.f32.mxu1 %v4937_v2 }
 0x23b   :  { %2779 = vmatprep.subr.mxu1 %v2697_v52 }
 0x23c   :  { %2780 = vmatpush1.msra.mxu1 %v2696_v51 }
 0x23d   :  { %v2693_v53 = vpop.permute.xlu1 %2692  ;;  %4789 = vmatmul.mubr.msk.f32.vlgmr.msra.gmra.mrb[2].mxu1 %vm2420_vm10, %v2434_v48  ;;  %v2926_v54 = vpop.permute.xlu0 %2925 }
 0x23e   :  { %v2698_v55 = vsel %vm296_vm3, %v2691_v50, %v2693_v53  ;;  %2850 = vmatprep.subr.mxu1 %v2693_v53  ;;  %2914 = vmatprep.mubr.f32.mxu1 %v4937_v2  ;;  %v4811_v53 = vld [vmem:[%s5552_s3 + $0x1c] sm:$0xf] }
 0x23f   :  { %2851 = vmatpush1.msra.mxu1 %v2698_v55 }
 0x241   :  { %v2928_v56 = vpop.permute.xlu1 %2927  ;;  %4790 = vmatmul.mubr.msk.f32.vlgmr.msra.gmra.mrb[4].mxu1 %vm2420_vm10, %v2434_v48  ;;  %v2924_v57 = vpop.permute.xlu0 %2923 }
 0x242   :  { %v2935_v58 = vsel %vm553_vm4, %v2924_v57, %v2926_v54  ;;  %v2936_v59 = vsel %vm553_vm4, %v2926_v54, %v2928_v56  ;;  %3013 = vmatprep.mubr.f32.mxu1 %v4937_v2 }
 0x243   :  { %2949 = vmatprep.subr.mxu1 %v2936_v59 }
 0x244   :  { %2950 = vmatpush1.msra.mxu1 %v2935_v58 }
 0x245   :  { %v2930_v61 = vpop.permute.xlu1 %2929  ;;  %4792 = vmatmul.mubr.msk.f32.vlgmr.msra.gmra.mrb[0].mxu1 %vm2420_vm10, %v4791_v60  ;;  %v2932_v62 = vpop.permute.xlu0 %2931 }
 0x246   :  { %v2937_v63 = vsel %vm553_vm4, %v2928_v56, %v2930_v61  ;;  %v2938_v0 = vsel %vm553_vm4, %v2930_v61, %v2932_v62  ;;  %3084 = vmatprep.mubr.f32.mxu1 %v4937_v2 }
 0x247   :  { %3020 = vmatprep.subr.mxu1 %v2938_v0 }
 0x248   :  { %3021 = vmatpush1.msra.mxu1 %v2937_v63  ;;  %v4815_v63 = vld [vmem:[%s5552_s3 + $0x20] sm:$0xf] }
 0x249   :  { %v2934_v1 = vpop.permute.xlu1 %2933  ;;  %4793 = vmatmul.mubr.msk.f32.vlgmr.msra.gmra.mrb[2].mxu1 %vm2420_vm10, %v4791_v60  ;;  %v3187_v3 = vpop.permute.xlu0 %3186 }
 0x24a   :  { %v2939_v4 = vsel %vm553_vm4, %v2932_v62, %v2934_v1  ;;  %3091 = vmatprep.subr.mxu1 %v2934_v1  ;;  %3155 = vmatprep.mubr.f32.mxu1 %v4937_v2 }
 0x24b   :  { %3092 = vmatpush1.msra.mxu1 %v2939_v4  ;;  %v4644_v4 = vld [vmem:[%s5547_s0 + $0x4] sm:$0xff] }
 0x24d   :  { %v3189_v5 = vpop.permute.xlu1 %3188  ;;  %4794 = vmatmul.mubr.msk.f32.vlgmr.msra.gmra.mrb[4].mxu1 %vm2420_vm10, %v4791_v60  ;;  %v3185_v9 = vpop.permute.xlu0 %3184 }
 0x24e   :  { %v3198_v14 = vsel %vm820_vm5, %v3185_v9, %v3187_v3  ;;  %v3199_v7 = vsel %vm820_vm5, %v3187_v3, %v3189_v5  ;;  %3277 = vmatprep.mubr.f32.mxu1 %v4937_v2 }
 0x24f   :  { %3213 = vmatprep.subr.mxu1 %v3199_v7 }
 0x250   :  { %3214 = vmatpush1.msra.mxu1 %v3198_v14  ;;  %v4662_v14 = vcombine.high %v4644_v4, %v4644_v4 }
 0x251   :  { %v3191_v10 = vpop.permute.xlu1 %3190  ;;  %4796 = vmatmul.mubr.msk.f32.vlgmr.msra.gmra.mrb[0].mxu1 %vm2420_vm10, %v4795_v8  ;;  %v3193_v11 = vpop.permute.xlu0 %3192 }
 0x252   :  { %v3200_v13 = vsel %vm820_vm5, %v3189_v5, %v3191_v10  ;;  %v3201_v16 = vsel %vm820_vm5, %v3191_v10, %v3193_v11  ;;  %3348 = vmatprep.mubr.f32.mxu1 %v4937_v2  ;;  %v4645_v10 = vld [vmem:[%s5547_s0 + $0xc] sm:$0xff] }
 0x253   :  { %3284 = vmatprep.subr.mxu1 %v3201_v16 }
 0x254   :  { %3285 = vmatpush1.msra.mxu1 %v3200_v13 }
 0x255   :  { %v3195_v12 = vpop.permute.xlu1 %3194  ;;  %4797 = vmatmul.mubr.msk.f32.vlgmr.msra.gmra.mrb[2].mxu1 %vm2420_vm10, %v4795_v8  ;;  %v3197_v17 = vpop.permute.xlu0 %3196 }
 0x256   :  { %v3202_v19 = vsel %vm820_vm5, %v3193_v11, %v3195_v12  ;;  %v3203_v20 = vsel %vm820_vm5, %v3195_v12, %v3197_v17  ;;  %3419 = vmatprep.mubr.f32.mxu1 %v4937_v2  ;;  %v4663_v17 = vcombine.high %v4645_v10, %v4645_v10 }
 0x257   :  { %3355 = vmatprep.subr.mxu1 %v3203_v20 }
 0x258   :  { %3356 = vmatpush1.msra.mxu1 %v3202_v19 }
 0x259   :  { %v3661_v21 = vpop.permute.xlu1 %3660  ;;  %4798 = vmatmul.mubr.msk.f32.vlgmr.msra.gmra.mrb[4].mxu1 %vm2420_vm10, %v4795_v8  ;;  %3437 = vmatprep.subr.mxu1 %v5289_v15  ;;  %v3663_v23 = vpop.permute.xlu0 %3662 }
 0x25a   :  { %3438 = vmatpush1.msra.mxu1 %v5287_v6  ;;  %3501 = vmatprep.mubr.f32.mxu1 %v4937_v2  ;;  %v3671_v28 = vsel %vm1329_vm6, %v3661_v21, %v3663_v23 }
 0x25b   :  { %3508 = vmatprep.subr.mxu1 %v5297_v22 }
 0x25d   :  { %v3659_v25 = vpop.permute.xlu1 %3658  ;;  %4800 = vmatmul.mubr.msk.f32.vlgmr.msra.gmra.mrb[0].mxu1 %vm2420_vm10, %v4799_v24  ;;  %v3665_v26 = vpop.permute.xlu0 %3664 }
 0x25e   :  { %3509 = vmatpush1.msra.mxu1 %v5295_v18  ;;  %3572 = vmatprep.mubr.f32.mxu1 %v4937_v2  ;;  %v3670_v22 = vsel %vm1329_vm6, %v3659_v25, %v3661_v21  ;;  %v4646_v21 = vld [vmem:[%s5547_s0 + $0x14] sm:$0xff] }
 0x25f   :  { %3579 = vmatprep.subr.mxu1 %v5342_v29 }
 0x261   :  { %v3667_v15 = vpop.permute.xlu1 %3666  ;;  %4801 = vmatmul.mubr.msk.f32.vlgmr.msra.gmra.mrb[2].mxu1 %vm2420_vm10, %v4799_v24  ;;  %v3669_v6 = vpop.permute.xlu0 %3668 }
 0x262   :  { %3580 = vmatpush1.msra.mxu1 %v5303_v27  ;;  %3643 = vmatprep.mubr.f32.mxu1 %v4937_v2  ;;  %v3673_v29 = vsel %vm1329_vm6, %v3665_v26, %v3667_v15  ;;  %v4803_v27 = vld [vmem:[%s5552_s3 + $0x14] sm:$0xf]  ;;  %v3672_v2 = vsel %vm1329_vm6, %v3663_v23, %v3665_v26  ;;  %v3674_v34 = vsel %vm1329_vm6, %v3667_v15, %v3669_v6 }
 0x263   :  { %3684 = vmatprep.subr.mxu1 %v3671_v28 }
 0x265   :  { %v3908_v30 = vpop.permute.xlu1 %3907  ;;  %4802 = vmatmul.mubr.msk.f32.vlgmr.msra.gmra.mrb[4].mxu1 %vm2420_vm10, %v4799_v24  ;;  %v3910_v18 = vpop.permute.xlu0 %3909 }
 0x266   :  { %3685 = vmatpush1.msra.mxu1 %v3670_v22  ;;  %3748 = vmatprep.mubr.f32.mxu1 %v5473_v31  ;;  %v3918_v37 = vsel %vm1592_vm7, %v3908_v30, %v3910_v18 }
 0x267   :  { %3755 = vmatprep.subr.mxu1 %v3673_v29 }
 0x269   :  { %v3906_v32 = vpop.permute.xlu1 %3905  ;;  %4804 = vmatmul.mubr.msk.f32.vlgmr.msra.gmra.mrb[0].mxu1 %vm2420_vm10, %v4803_v27  ;;  %v3912_v33 = vpop.permute.xlu0 %3911 }
 0x26a   :  { %3756 = vmatpush1.msra.mxu1 %v3672_v2  ;;  %3819 = vmatprep.mubr.f32.mxu1 %v5473_v31  ;;  %v3917_v38 = vsel %vm1592_vm7, %v3906_v32, %v3908_v30  ;;  %v3919_v43 = vsel %vm1592_vm7, %v3910_v18, %v3912_v33 }
 0x26b   :  { %3826 = vmatprep.subr.mxu1 %v3669_v6  ;;  %v4664_v6 = vcombine.high %v4646_v21, %v4646_v21 }
 0x26d   :  { %v3914_v35 = vpop.permute.xlu1 %3913  ;;  %4805 = vmatmul.mubr.msk.f32.vlgmr.msra.gmra.mrb[2].mxu1 %vm2420_vm10, %v4803_v27  ;;  %v3916_v36 = vpop.permute.xlu0 %3915 }
 0x26e   :  { %3827 = vmatpush1.msra.mxu1 %v3674_v34  ;;  %3890 = vmatprep.mubr.f32.mxu1 %v5473_v31  ;;  %v3920_v41 = vsel %vm1592_vm7, %v3912_v33, %v3914_v35  ;;  %v3921_v46 = vsel %vm1592_vm7, %v3914_v35, %v3916_v36 }
 0x26f   :  { %3931 = vmatprep.subr.mxu1 %v3918_v37 }
 0x271   :  { %v4155_v39 = vpop.permute.xlu1 %4154  ;;  %4806 = vmatmul.mubr.msk.f32.vlgmr.msra.gmra.mrb[4].mxu1 %vm2420_vm10, %v4803_v27  ;;  %v4157_v40 = vpop.permute.xlu0 %4156 }
 0x272   :  { %3932 = vmatpush1.msra.mxu1 %v3917_v38  ;;  %3995 = vmatprep.mubr.f32.mxu1 %v5473_v31  ;;  %v4165_v48 = vsel %vm1855_vm8, %v4155_v39, %v4157_v40 }
 0x273   :  { %4002 = vmatprep.subr.mxu1 %v3920_v41 }
 0x275   :  { %v4153_v44 = vpop.permute.xlu1 %4152  ;;  %4808 = vmatmul.mubr.msk.f32.vlgmr.msra.gmra.mrb[0].mxu1 %vm2420_vm10, %v4807_v42  ;;  %v4159_v45 = vpop.permute.xlu0 %4158 }
 0x276   :  { %4003 = vmatpush1.msra.mxu1 %v3919_v43  ;;  %4066 = vmatprep.mubr.f32.mxu1 %v5473_v31  ;;  %v4164_v50 = vsel %vm1855_vm8, %v4153_v44, %v4155_v39  ;;  %v4166_v54 = vsel %vm1855_vm8, %v4157_v40, %v4159_v45 }
 0x277   :  { %4073 = vmatprep.subr.mxu1 %v3916_v36 }
 0x279   :  { %v4161_v47 = vpop.permute.xlu1 %4160  ;;  %4809 = vmatmul.mubr.msk.f32.vlgmr.msra.gmra.mrb[2].mxu1 %vm2420_vm10, %v4807_v42  ;;  %v4163_v49 = vpop.permute.xlu0 %4162 }
 0x27a   :  { %4074 = vmatpush1.msra.mxu1 %v3921_v46  ;;  %4137 = vmatprep.mubr.f32.mxu1 %v5473_v31  ;;  %v4167_v52 = vsel %vm1855_vm8, %v4159_v45, %v4161_v47  ;;  %v4168_v57 = vsel %vm1855_vm8, %v4161_v47, %v4163_v49 }
 0x27b   :  { %4178 = vmatprep.subr.mxu1 %v4165_v48 }
 0x27d   :  { %v4402_v51 = vpop.permute.xlu1 %4401  ;;  %4810 = vmatmul.mubr.msk.f32.vlgmr.msra.gmra.mrb[4].mxu1 %vm2420_vm10, %v4807_v42  ;;  %v4404_v56 = vpop.permute.xlu0 %4403 }
 0x27e   :  { %4179 = vmatpush1.msra.mxu1 %v4164_v50  ;;  %4242 = vmatprep.mubr.f32.mxu1 %v5473_v31  ;;  %v4412_v58 = vsel %vm2118_vm9, %v4402_v51, %v4404_v56 }
 0x27f   :  { %4249 = vmatprep.subr.mxu1 %v4167_v52 }
 0x281   :  { %v4400_v55 = vpop.permute.xlu1 %4399  ;;  %4812 = vmatmul.mubr.msk.f32.vlgmr.msra.gmra.mrb[0].mxu1 %vm2420_vm10, %v4811_v53  ;;  %v4406_v60 = vpop.permute.xlu0 %4405 }
 0x282   :  { %4250 = vmatpush1.msra.mxu1 %v4166_v54  ;;  %4313 = vmatprep.mubr.f32.mxu1 %v5473_v31  ;;  %v4411_v61 = vsel %vm2118_vm9, %v4400_v55, %v4402_v51  ;;  %v4413_v0 = vsel %vm2118_vm9, %v4404_v56, %v4406_v60 }
 0x283   :  { %4320 = vmatprep.subr.mxu1 %v4163_v49 }
 0x285   :  { %4813 = vmatmul.mubr.msk.f32.vlgmr.msra.gmra.mrb[2].mxu1 %vm2420_vm10, %v4811_v53  ;;  %v4408_v59 = vpop.permute.xlu1 %4407  ;;  %v4410_v1 = vpop.permute.xlu0 %4409 }
 0x286   :  { %4321 = vmatpush1.msra.mxu1 %v4168_v57  ;;  %4384 = vmatprep.mubr.f32.mxu1 %v5473_v31  ;;  %v4414_v62 = vsel %vm2118_vm9, %v4406_v60, %v4408_v59  ;;  %v4415_v3 = vsel %vm2118_vm9, %v4408_v59, %v4410_v1 }
 0x287   :  { %4425 = vmatprep.subr.mxu1 %v4412_v58 }
 0x289   :  { %4814 = vmatmul.mubr.msk.f32.vlgmr.msra.gmra.mrb[4].mxu1 %vm2420_vm10, %v4811_v53 }
 0x28a   :  { %4426 = vmatpush1.msra.mxu1 %v4411_v61  ;;  %4489 = vmatprep.mubr.f32.mxu1 %v5473_v31 }
 0x28b   :  { %4496 = vmatprep.subr.mxu1 %v4414_v62 }
 0x28d   :  { %4816 = vmatmul.mubr.msk.f32.vlgmr.msra.gmra.mrb[0].mxu1 %vm2420_vm10, %v4815_v63 }
 0x28e   :  { %4497 = vmatpush1.msra.mxu1 %v4413_v0  ;;  %4560 = vmatprep.mubr.f32.mxu1 %v5473_v31 }
 0x28f   :  { %4567 = vmatprep.subr.mxu1 %v4410_v1 }
 0x291   :  { %4817 = vmatmul.mubr.msk.f32.vlgmr.msra.gmra.mrb[2].mxu1 %vm2420_vm10, %v4815_v63 }
 0x292   :  { %4568 = vmatpush1.msra.mxu1 %v4415_v3  ;;  %4631 = vmatprep.mubr.f32.mxu1 %v5473_v31 }
 0x295   :  { %4818 = vmatmul.mubr.msk.f32.vlgmr.msra.gmra.mrb[4].mxu1 %vm2420_vm10, %v4815_v63 }
 0x296   :  { %v4651_v5 = vpop.permute.xlu1 %4650 }
 0x360   :  { %v4491_v9 = vpop.f32.mrb[0].mxu1 }
 0x361   :  { %v4653_v7 = vadd.f32 %v4651_v5, %v4491_v9  ;;  %v4493_v8 = vpop.f32.mrb[1].mxu1 }
 0x362   :  { %v4654_v11 = vadd.f32 %v4651_v5, %v4493_v8 }
 0x363   :  { %v4668_v13 = vadd.f32 %v4653_v7, %v4644_v4 }
 0x364   :  { %v4669_v16 = vadd.f32 %v4662_v14, %v4654_v11  ;;  %v4562_v12 = vpop.f32.mrb[2].mxu1 }
 0x365   :  { %v4655_v19 = vadd.f32 %v4651_v5, %v4562_v12  ;;  %v4564_v20 = vpop.f32.mrb[3].mxu1 }
 0x366   :  { %v4680_v23 = vcombine.low %v4668_v13, %v4669_v16  ;;  %v4656_v24 = vadd.f32 %v4651_v5, %v4564_v20 }
 0x367   :  { %v4670_v25 = vadd.f32 %v4655_v19, %v4645_v10 }
 0x368   :  { %4686 = vst [vmem:[%s5553_s6] sm:$0xff] %v4680_v23  ;;  %v4671_v26 = vadd.f32 %v4663_v17, %v4656_v24  ;;  %v4633_v15 = vpop.f32.mrb[4].mxu1 }
 0x369   :  { %v4657_v28 = vadd.f32 %v4651_v5, %v4633_v15  ;;  %v4635_v22 = vpop.f32.mrb[5].mxu1 }
 0x36a   :  { %v4681_v30 = vcombine.low %v4670_v25, %v4671_v26  ;;  %v4658_v18 = vadd.f32 %v4651_v5, %v4635_v22 }
 0x36b   :  { %v4672_v29 = vadd.f32 %v4657_v28, %v4646_v21 }
 0x36c   :  { %4687 = vst [vmem:[%s5553_s6 + $0x8] sm:$0xff] %v4681_v30  ;;  %v4673_v31 = vadd.f32 %v4664_v6, %v4658_v18 }
 0x36e   :  { %v4682_v27 = vcombine.low %v4672_v29, %v4673_v31 }
 0x370   :  { %4690 = vst.msk [vmem:[%s5553_s6 + $0x10] sm:$0xff] %vm4689_vm12, %v4682_v27 }

</bundles_post_ra>
